<compile_context>
chip_gen: v7x
topology: tpu7x:2x2x1
jax: 0.10.0
libtpu: 0.0.40
codegen_flags: <defaults>
</compile_context>

<pallas_src>
import functools

import jax
import jax.numpy as jnp
from jax import lax
from jax.experimental import pallas as pl
from jax.experimental.pallas import tpu as pltpu

NEG_INF = -1e9
LN_EPS = 1e-5


# ----------------------------- kernel helpers -----------------------------

def _layer_norm(x, w, b):
    mu = jnp.mean(x, axis=-1, keepdims=True)
    var = jnp.mean((x - mu) ** 2, axis=-1, keepdims=True)
    return (x - mu) * lax.rsqrt(var + LN_EPS) * w + b


def clip_stack_kernel(x_ref, mask_ref,
                      ln1_ref, wqkv_ref, bqkv_ref, wo_ref, bo_ref,
                      ln2_ref, w1_ref, b1_ref, w2_ref, b2_ref,
                      fln_ref,
                      o_ref,
                      ctx_sc,
                      *, num_heads):
    """One grid step = one CLIP encoder layer applied to one batch block.

    grid = (batch_blocks, num_layers).  The residual stream is carried in
    `o_ref` (its index_map ignores the layer id, so the block stays resident in
    VMEM across the layer axis); the final LayerNorm is fused into the last
    layer step.
    """
    l = pl.program_id(1)
    n_layers = pl.num_programs(1)

    @pl.when(l == 0)
    def _():
        o_ref[...] = x_ref[...]            # load embeddings once per batch block

    x = o_ref[...]                          # [Bb, S, D] f32 residual stream
    Bb, S, D = x.shape
    hd = D // num_heads
    bf16 = jnp.bfloat16

    # ---------------- self-attention block (pre-LN, causal) ----------------
    ln1 = ln1_ref[0]                        # [2, D]  (row0 = weight, row1 = bias)
    h = _layer_norm(x, ln1[0], ln1[1])
    hb = h.reshape(Bb * S, D).astype(bf16)

    # fused QKV projection; 1/sqrt(head_dim) is already folded into the Q columns.
    qkv = jnp.dot(hb, wqkv_ref[0], preferred_element_type=jnp.float32) + bqkv_ref[0, 0]
    qkv = qkv.reshape(Bb, S, 3 * D)
    q = qkv[:, :, :D]
    k = qkv[:, :, D:2 * D]
    v = qkv[:, :, 2 * D:]

    mask = mask_ref[...]                    # [S, S] additive causal bias

    for hidx in range(num_heads):           # static unroll over heads
        sl = slice(hidx * hd, (hidx + 1) * hd)
        qh = q[:, :, sl].astype(bf16)       # [Bb, S, hd]
        kh = k[:, :, sl].astype(bf16)
        vh = v[:, :, sl].astype(bf16)
        s = jnp.einsum("bqd,bkd->bqk", qh, kh,
                       preferred_element_type=jnp.float32)       # [Bb, S, S]
        s = s + mask
        s = s - jnp.max(s, axis=-1, keepdims=True)
        p = jnp.exp(s)
        p = p / jnp.sum(p, axis=-1, keepdims=True)                # exact softmax
        ctx = jnp.einsum("bqk,bkd->bqd", p.astype(bf16), vh,
                         preferred_element_type=jnp.float32)      # [Bb, S, hd]
        # park this head's context at its lane slice; output projection is one
        # full-depth matmul below (no per-head K=hd matmuls / f32 accumulates).
        ctx_sc[:, sl] = ctx.reshape(Bb * S, hd).astype(bf16)

    attn_out = jnp.dot(ctx_sc[...], wo_ref[0],
                       preferred_element_type=jnp.float32) + bo_ref[0, 0]
    x = x + attn_out.reshape(Bb, S, D)

    # ----------------------------- MLP block -----------------------------
    ln2 = ln2_ref[0]
    h = _layer_norm(x, ln2[0], ln2[1])
    hb = h.reshape(Bb * S, D).astype(bf16)
    h1 = jnp.dot(hb, w1_ref[0], preferred_element_type=jnp.float32) + b1_ref[0, 0]
    h1b = h1.astype(bf16)                   # quick_gelu in bf16 (feeds bf16 matmul)
    h1b = h1b * (1.0 / (1.0 + jnp.exp(-1.702 * h1b)))
    h2 = jnp.dot(h1b, w2_ref[0], preferred_element_type=jnp.float32) + b2_ref[0, 0]
    x = x + h2.reshape(Bb, S, D)

    @pl.when(l < n_layers - 1)
    def _():
        o_ref[...] = x                      # carry residual to next layer

    @pl.when(l == n_layers - 1)
    def _():
        fln = fln_ref[...]                  # [2, D]
        o_ref[...] = _layer_norm(x, fln[0], fln[1])   # fused final LayerNorm


# ------------------------------ wrappers ------------------------------

def _round_up(n, m):
    return ((n + m - 1) // m) * m


def _pick_block_b(B, cap=16):
    """Largest divisor of B that still leaves >= 2 batch blocks (v7x megacore)."""
    if B <= 1:
        return 1
    target = min(max(B // 2, 1), cap)
    for bb in range(target, 0, -1):
        if B % bb == 0:
            return bb
    return 1


def _pick_vmem_limit():
    """~75% of physical VMEM: headroom on v7x (64 MiB), above v5e/v6e scoped defaults."""
    try:
        cap = int(pltpu.get_tpu_info().vmem_capacity_bytes)
    except Exception:
        cap = 64 * 1024 * 1024
    return int(min(cap * 3 // 4, 100 * 1024 * 1024))


def clip_text_encoder(x, mask_bias, params, *, num_heads, block_b=None):
    """Run all encoder layers + final LN in one pallas_call.

    x: [B, S, D] f32 token+pos embeddings (S already padded to a multiple of 8).
    Returns last_hidden_state [B, S, D].
    """
    B, S, D = x.shape
    L = params["wqkv"].shape[0]
    F = params["w1"].shape[2]
    assert D % num_heads == 0
    assert S % 8 == 0, "pad the sequence to a multiple of 8 before calling"

    if block_b is None:
        block_b = _pick_block_b(B)
    assert B % block_b == 0
    nbb = B // block_b

    def wspec(shape):
        # per-layer stacked weight [L, *shape]: indexed by the layer id so
        # BlockSpec double-buffering prefetches layer l+1 while l computes.
        n = len(shape)
        return pl.BlockSpec((1,) + shape, lambda b, l, n=n: (l,) + (0,) * n)

    def inv(shape):
        # grid-invariant input
        n = len(shape)
        return pl.BlockSpec(shape, lambda b, l, n=n: (0,) * n)

    xspec = pl.BlockSpec((block_b, S, D), lambda b, l: (b, 0, 0))

    return pl.pallas_call(
        functools.partial(clip_stack_kernel, num_heads=num_heads),
        out_shape=jax.ShapeDtypeStruct((B, S, D), jnp.float32),
        grid=(nbb, L),
        in_specs=[
            xspec,                       # token+pos embeddings
            inv((S, S)),                 # additive causal mask
            wspec((2, D)),               # ln1 (w, b)
            wspec((D, 3 * D)),           # wqkv (bf16, Q-scale folded)
            wspec((1, 3 * D)),           # bqkv
            wspec((D, D)),               # wo   (bf16)
            wspec((1, D)),               # bo
            wspec((2, D)),               # ln2 (w, b)
            wspec((D, F)),               # w1   (bf16)
            wspec((1, F)),               # b1
            wspec((F, D)),               # w2   (bf16)
            wspec((1, D)),               # b2
            inv((2, D)),                 # final LN (w, b)  -- rank fixed
        ],
        out_specs=xspec,                 # residual carrier, resident across layers
        scratch_shapes=[pltpu.VMEM((block_b * S, D), jnp.bfloat16)],  # per-head ctx
        compiler_params=pltpu.CompilerParams(
            dimension_semantics=("parallel", "arbitrary"),
            vmem_limit_bytes=_pick_vmem_limit()),
    )(x, mask_bias,
      params["ln1"], params["wqkv"], params["bqkv"], params["wo"], params["bo"],
      params["ln2"], params["w1"], params["b1"], params["w2"], params["b2"],
      params["fln"])


def prepare_params(params, num_heads):
    """One-time weight prep: fold 1/sqrt(head_dim) into the Q columns of wqkv/bqkv."""
    D = params["token_emb"].shape[1]
    hd = D // num_heads
    scale = float(hd) ** -0.5
    wqkv, bqkv = params["wqkv"], params["bqkv"]
    wq = (wqkv[:, :, :D].astype(jnp.float32) * scale).astype(wqkv.dtype)
    bq = bqkv[:, :, :D] * scale
    p = dict(params)
    p["wqkv"] = jnp.concatenate([wq, wqkv[:, :, D:]], axis=-1)
    p["bqkv"] = jnp.concatenate([bq, bqkv[:, :, D:]], axis=-1)
    return p


def pubmed_clip_embedder(input_ids, prepped_params, num_heads):
    """CLIP text model forward: returns last_hidden_state [B, S, D]."""
    # TODO(synk): HF tokenizer (string -> ids) is not translatable; ids are inputs.
    p = prepped_params
    x = jnp.take(p["token_emb"], input_ids, axis=0) + p["pos_emb"][None, :, :]
    B, S, D = x.shape

    # pad the sequence to a sublane multiple (e.g. 77 -> 80 at real CLIP sizes)
    S_pad = _round_up(S, 8)
    if S_pad != S:
        x = jnp.pad(x, ((0, 0), (0, S_pad - S), (0, 0)))
    causal = jnp.tril(jnp.ones((S_pad, S_pad), bool))
    key_valid = (jnp.arange(S_pad) < S)[None, :]
    mask_bias = jnp.where(causal & key_valid, 0.0, NEG_INF).astype(jnp.float32)

    z = clip_text_encoder(x, mask_bias, p, num_heads=num_heads)
    return z[:, :S, :]


# --------------------------- pure-JAX reference ---------------------------

def _ref_forward(input_ids, params, num_heads):
    bf16 = jnp.bfloat16
    x = jnp.take(params["token_emb"], input_ids, axis=0) + params["pos_emb"][None]
    B, S, D = x.shape
    L = params["wqkv"].shape[0]
    hd = D // num_heads
    scale = float(hd) ** -0.5
    causal = jnp.tril(jnp.ones((S, S), bool))

    def ln(y, w, b):
        mu = jnp.mean(y, -1, keepdims=True)
        var = jnp.mean((y - mu) ** 2, -1, keepdims=True)
        return (y - mu) / jnp.sqrt(var + LN_EPS) * w + b

    def mm(a, w):
        return jnp.dot(a.astype(bf16), w, preferred_element_type=jnp.float32)

    for l in range(L):
        h = ln(x, params["ln1"][l, 0], params["ln1"][l, 1])
        qkv = mm(h.reshape(B * S, D), params["wqkv"][l]) + params["bqkv"][l, 0]
        qkv = qkv.reshape(B, S, 3 * D)
        q, k, v = jnp.split(qkv, 3, axis=-1)
        q = q.reshape(B, S, num_heads, hd).transpose(0, 2, 1, 3) * scale
        k = k.reshape(B, S, num_heads, hd).transpose(0, 2, 1, 3)
        v = v.reshape(B, S, num_heads, hd).transpose(0, 2, 1, 3)
        s = jnp.einsum("bhqd,bhkd->bhqk", q, k)
        s = jnp.where(causal[None, None], s, NEG_INF)
        p = jax.nn.softmax(s, axis=-1)
        ctx = jnp.einsum("bhqk,bhkd->bhqd", p, v)
        ctx = ctx.transpose(0, 2, 1, 3).reshape(B * S, D)
        x = x + (mm(ctx, params["wo"][l]) + params["bo"][l, 0]).reshape(B, S, D)

        h = ln(x, params["ln2"][l, 0], params["ln2"][l, 1])
        h1 = mm(h.reshape(B * S, D), params["w1"][l]) + params["b1"][l, 0]
        h1 = h1 * jax.nn.sigmoid(1.702 * h1)
        x = x + (mm(h1, params["w2"][l]) + params["b2"][l, 0]).reshape(B, S, D)

    return ln(x, params["fln"][0], params["fln"][1])


# ------------------------------- params -------------------------------

def _init_params(key, vocab, seq, d_model, d_ff, n_layers):
    L, D, F = n_layers, d_model, d_ff
    ks = jax.random.split(key, 13)
    wscale = 0.05

    def ln_params(k, n_layers_=None):
        kw, kb = jax.random.split(k)
        if n_layers_ is None:
            w = 1.0 + 0.05 * jax.random.normal(kw, (D,), jnp.float32)
            b = 0.02 * jax.random.normal(kb, (D,), jnp.float32)
            return jnp.stack([w, b], axis=0)                       # [2, D]
        w = 1.0 + 0.05 * jax.random.normal(kw, (n_layers_, 1, D), jnp.float32)
        b = 0.02 * jax.random.normal(kb, (n_layers_, 1, D), jnp.float32)
        return jnp.concatenate([w, b], axis=1)                     # [L, 2, D]

    return {
        "token_emb": 0.02 * jax.random.normal(ks[0], (vocab, D), jnp.float32),
        "pos_emb": 0.02 * jax.random.normal(ks[1], (seq, D), jnp.float32),
        "ln1": ln_params(ks[2], L),                                # [L, 2, D]
        "ln2": ln_params(ks[3], L),                                # [L, 2, D]
        "wqkv": (wscale * jax.random.normal(ks[4], (L, D, 3 * D), jnp.float32)
                 ).astype(jnp.bfloat16),
        "bqkv": 0.02 * jax.random.normal(ks[5], (L, 1, 3 * D), jnp.float32),
        "wo": (wscale * jax.random.normal(ks[6], (L, D, D), jnp.float32)
               ).astype(jnp.bfloat16),
        "bo": 0.02 * jax.random.normal(ks[7], (L, 1, D), jnp.float32),
        "w1": (wscale * jax.random.normal(ks[8], (L, D, F), jnp.float32)
               ).astype(jnp.bfloat16),
        "b1": 0.02 * jax.random.normal(ks[9], (L, 1, F), jnp.float32),
        "w2": (wscale * jax.random.normal(ks[10], (L, F, D), jnp.float32)
               ).astype(jnp.bfloat16),
        "b2": 0.02 * jax.random.normal(ks[11], (L, 1, D), jnp.float32),
        "fln": ln_params(ks[12]),                                  # [2, D]
    }


# ------------------------------- main -------------------------------

if __name__ == "__main__":
    # Small synthetic config consistent with a CLIP text encoder
    # (real PubMedCLIP: D=512, H=8, L=12, F=2048, S=77, vocab=49408).
    B, S, D, H, F, L, VOCAB = 2, 8, 32, 4, 64, 2, 64

    key = jax.random.PRNGKey(0)
    pkey, tkey = jax.random.split(key)
    params = _init_params(pkey, VOCAB, S, D, F, L)
    kernel_params = prepare_params(params, H)       # one-time weight prep

    # "tokenized" input ids (the tokenizer itself is not translatable to Pallas).
    input_ids = jax.random.randint(tkey, (B, S), 0, VOCAB, dtype=jnp.int32)

    z = pubmed_clip_embedder(input_ids, kernel_params, num_heads=H)
    z = jax.block_until_ready(z)

    z_ref = _ref_forward(input_ids, params, num_heads=H)
    assert z.shape == (B, S, D)
    max_err = float(jnp.max(jnp.abs(z - z_ref)))
    assert jnp.allclose(z, z_ref, atol=2.5e-2, rtol=2.5e-2), (
        f"mismatch vs ref, max_err={max_err}")

    print("KERNEL_OK")
</pallas_src>

<mosaic_0001>
module attributes {stable_mosaic.version = 11 : i64} {
  func.func @clip_stack_kernel(%arg0: i32, %arg1: i32, %arg2: memref<1x8x32xf32, #tpu.memory_space<vmem>>, %arg3: memref<8x8xf32, #tpu.memory_space<vmem>>, %arg4: memref<1x2x32xf32, #tpu.memory_space<vmem>>, %arg5: memref<1x32x96xbf16, #tpu.memory_space<vmem>>, %arg6: memref<1x1x96xf32, #tpu.memory_space<vmem>>, %arg7: memref<1x32x32xbf16, #tpu.memory_space<vmem>>, %arg8: memref<1x1x32xf32, #tpu.memory_space<vmem>>, %arg9: memref<1x2x32xf32, #tpu.memory_space<vmem>>, %arg10: memref<1x32x64xbf16, #tpu.memory_space<vmem>>, %arg11: memref<1x1x64xf32, #tpu.memory_space<vmem>>, %arg12: memref<1x64x32xbf16, #tpu.memory_space<vmem>>, %arg13: memref<1x1x32xf32, #tpu.memory_space<vmem>>, %arg14: memref<2x32xf32, #tpu.memory_space<vmem>>, %arg15: memref<1x8x32xf32, #tpu.memory_space<vmem>>, %arg16: memref<8x32xbf16, #tpu.memory_space<vmem>>) attributes {dimension_semantics = [#tpu.dimension_semantics<parallel>, #tpu.dimension_semantics<arbitrary>], iteration_bounds = array<i64: 2, 2>, scalar_prefetch = 0 : i64, scratch_operands = 1 : i64, tpu.core_type = #tpu.core_type<tc>, window_params = [{transform_indices = @transform_0, window_bounds = array<i64: 1, 8, 32>}, {pipeline_mode = #tpu.pipeline_mode<synchronous>, transform_indices = @transform_1, window_bounds = array<i64: 8, 8>}, {transform_indices = @transform_2, window_bounds = array<i64: 1, 2, 32>}, {transform_indices = @transform_3, window_bounds = array<i64: 1, 32, 96>}, {transform_indices = @transform_4, window_bounds = array<i64: 1, 1, 96>}, {transform_indices = @transform_5, window_bounds = array<i64: 1, 32, 32>}, {transform_indices = @transform_6, window_bounds = array<i64: 1, 1, 32>}, {transform_indices = @transform_7, window_bounds = array<i64: 1, 2, 32>}, {transform_indices = @transform_8, window_bounds = array<i64: 1, 32, 64>}, {transform_indices = @transform_9, window_bounds = array<i64: 1, 1, 64>}, {transform_indices = @transform_10, window_bounds = array<i64: 1, 64, 32>}, {transform_indices = @transform_11, window_bounds = array<i64: 1, 1, 32>}, {pipeline_mode = #tpu.pipeline_mode<synchronous>, transform_indices = @transform_12, window_bounds = array<i64: 2, 32>}, {transform_indices = @transform_13, window_bounds = array<i64: 1, 8, 32>}]} {
    %c0_i32 = arith.constant 0 : i32
    %0 = arith.cmpi eq, %arg1, %c0_i32 : i32
    %1 = arith.extui %0 : i1 to i32
    %c0_i32_0 = arith.constant 0 : i32
    %2 = arith.cmpi ne, %1, %c0_i32_0 : i32
    scf.if %2 {
      %c0_77 = arith.constant 0 : index
      %c0_78 = arith.constant 0 : index
      %c0_79 = arith.constant 0 : index
      %217 = vector.load %arg2[%c0_77, %c0_78, %c0_79] : memref<1x8x32xf32, #tpu.memory_space<vmem>>, vector<1x8x32xf32>
      %c0_80 = arith.constant 0 : index
      %c0_81 = arith.constant 0 : index
      %c0_82 = arith.constant 0 : index
      %218 = vector.load %arg15[%c0_80, %c0_81, %c0_82] : memref<1x8x32xf32, #tpu.memory_space<vmem>>, vector<1x8x32xf32>
      tpu.vector_store %arg15[%c0_80, %c0_81, %c0_82], %217 {strides = array<i32>} : memref<1x8x32xf32, #tpu.memory_space<vmem>>, vector<1x8x32xf32>,
    } else {
    }
    %c0 = arith.constant 0 : index
    %c0_1 = arith.constant 0 : index
    %c0_2 = arith.constant 0 : index
    %3 = vector.load %arg15[%c0, %c0_1, %c0_2] : memref<1x8x32xf32, #tpu.memory_space<vmem>>, vector<1x8x32xf32>
    %c0_3 = arith.constant 0 : index
    %c0_4 = arith.constant 0 : index
    %c0_5 = arith.constant 0 : index
    %4 = vector.load %arg4[%c0_3, %c0_4, %c0_5] : memref<1x2x32xf32, #tpu.memory_space<vmem>>, vector<1x2x32xf32>
    %5 = vector.shape_cast %4 : vector<1x2x32xf32> to vector<2x32xf32>
    %6 = vector.extract_strided_slice %5 {offsets = [0, 0], sizes = [1, 32], strides = [1, 1]} : vector<2x32xf32> to vector<1x32xf32>
    %7 = vector.shape_cast %6 : vector<1x32xf32> to vector<32xf32>
    %8 = vector.extract_strided_slice %5 {offsets = [1, 0], sizes = [1, 32], strides = [1, 1]} : vector<2x32xf32> to vector<1x32xf32>
    %9 = vector.shape_cast %8 : vector<1x32xf32> to vector<32xf32>
    %cst = arith.constant dense<0.000000e+00> : vector<1x8xf32>
    %10 = vector.multi_reduction <add>, %3, %cst [2] : vector<1x8x32xf32> to vector<1x8xf32>
    %11 = vector.shape_cast %10 : vector<1x8xf32> to vector<1x8x1xf32>
    %cst_6 = arith.constant 3.200000e+01 : f32
    %12 = vector.broadcast %cst_6 : f32 to vector<1x8x1xf32>
    %13 = arith.divf %11, %12 : vector<1x8x1xf32>
    %14 = vector.broadcast %13 : vector<1x8x1xf32> to vector<1x8x32xf32>
    %15 = arith.subf %3, %14 : vector<1x8x32xf32>
    %16 = arith.mulf %15, %15 : vector<1x8x32xf32>
    %cst_7 = arith.constant dense<0.000000e+00> : vector<1x8xf32>
    %17 = vector.multi_reduction <add>, %16, %cst_7 [2] : vector<1x8x32xf32> to vector<1x8xf32>
    %18 = vector.shape_cast %17 : vector<1x8xf32> to vector<1x8x1xf32>
    %cst_8 = arith.constant 3.200000e+01 : f32
    %19 = vector.broadcast %cst_8 : f32 to vector<1x8x1xf32>
    %20 = arith.divf %18, %19 : vector<1x8x1xf32>
    %21 = vector.broadcast %13 : vector<1x8x1xf32> to vector<1x8x32xf32>
    %22 = arith.subf %3, %21 : vector<1x8x32xf32>
    %cst_9 = arith.constant 9.99999974E-6 : f32
    %23 = vector.broadcast %cst_9 : f32 to vector<1x8x1xf32>
    %24 = arith.addf %20, %23 : vector<1x8x1xf32>
    %25 = math.rsqrt %24 : vector<1x8x1xf32>
    %26 = vector.broadcast %25 : vector<1x8x1xf32> to vector<1x8x32xf32>
    %27 = arith.mulf %22, %26 : vector<1x8x32xf32>
    %28 = vector.shape_cast %7 : vector<32xf32> to vector<1x1x32xf32>
    %29 = vector.broadcast %28 : vector<1x1x32xf32> to vector<1x8x32xf32>
    %30 = arith.mulf %27, %29 : vector<1x8x32xf32>
    %31 = vector.shape_cast %9 : vector<32xf32> to vector<1x1x32xf32>
    %32 = vector.broadcast %31 : vector<1x1x32xf32> to vector<1x8x32xf32>
    %33 = arith.addf %30, %32 : vector<1x8x32xf32>
    %34 = vector.shape_cast %33 : vector<1x8x32xf32> to vector<8x32xf32>
    %35 = arith.truncf %34 : vector<8x32xf32> to vector<8x32xbf16>
    %c0_10 = arith.constant 0 : index
    %c0_11 = arith.constant 0 : index
    %c0_12 = arith.constant 0 : index
    %36 = vector.load %arg5[%c0_10, %c0_11, %c0_12] : memref<1x32x96xbf16, #tpu.memory_space<vmem>>, vector<1x32x96xbf16>
    %37 = vector.shape_cast %36 : vector<1x32x96xbf16> to vector<32x96xbf16>
    %cst_13 = arith.constant dense<0.000000e+00> : vector<8x96xf32>
    %38 = tpu.matmul %35, %37, %cst_13 {dimension_numbers = #tpu.dot_dimension_numbers<[1], [0], [0], [1], [0, 0, 1, 1], [], []>} : vector<8x32xbf16>, vector<32x96xbf16>, vector<8x96xf32> -> vector<8x96xf32>
    %c0_14 = arith.constant 0 : index
    %c0_15 = arith.constant 0 : index
    %c0_16 = arith.constant 0 : index
    %39 = vector.load %arg6[%c0_14, %c0_15, %c0_16] : memref<1x1x96xf32, #tpu.memory_space<vmem>>, vector<1x1x96xf32>
    %40 = vector.shape_cast %39 : vector<1x1x96xf32> to vector<96xf32>
    %41 = vector.shape_cast %40 : vector<96xf32> to vector<1x96xf32>
    %42 = vector.broadcast %41 : vector<1x96xf32> to vector<8x96xf32>
    %43 = arith.addf %38, %42 : vector<8x96xf32>
    %44 = vector.shape_cast %43 : vector<8x96xf32> to vector<1x8x96xf32>
    %45 = vector.extract_strided_slice %44 {offsets = [0, 0, 0], sizes = [1, 8, 32], strides = [1, 1, 1]} : vector<1x8x96xf32> to vector<1x8x32xf32>
    %46 = vector.extract_strided_slice %44 {offsets = [0, 0, 32], sizes = [1, 8, 32], strides = [1, 1, 1]} : vector<1x8x96xf32> to vector<1x8x32xf32>
    %47 = vector.extract_strided_slice %44 {offsets = [0, 0, 64], sizes = [1, 8, 32], strides = [1, 1, 1]} : vector<1x8x96xf32> to vector<1x8x32xf32>
    %c0_17 = arith.constant 0 : index
    %c0_18 = arith.constant 0 : index
    %48 = vector.load %arg3[%c0_17, %c0_18] : memref<8x8xf32, #tpu.memory_space<vmem>>, vector<8x8xf32>
    %49 = vector.extract_strided_slice %45 {offsets = [0, 0, 0], sizes = [1, 8, 8], strides = [1, 1, 1]} : vector<1x8x32xf32> to vector<1x8x8xf32>
    %50 = arith.truncf %49 : vector<1x8x8xf32> to vector<1x8x8xbf16>
    %51 = vector.extract_strided_slice %46 {offsets = [0, 0, 0], sizes = [1, 8, 8], strides = [1, 1, 1]} : vector<1x8x32xf32> to vector<1x8x8xf32>
    %52 = arith.truncf %51 : vector<1x8x8xf32> to vector<1x8x8xbf16>
    %53 = vector.extract_strided_slice %47 {offsets = [0, 0, 0], sizes = [1, 8, 8], strides = [1, 1, 1]} : vector<1x8x32xf32> to vector<1x8x8xf32>
    %54 = arith.truncf %53 : vector<1x8x8xf32> to vector<1x8x8xbf16>
    "tpu.trace_start"() <{level = 10 : i32, message = "bqd,bkd->bqk"}> : () -> ()
    %cst_19 = arith.constant dense<0.000000e+00> : vector<1x8x8xf32>
    %55 = tpu.matmul %50, %52, %cst_19 {dimension_numbers = #tpu.dot_dimension_numbers<[2], [2], [1], [1], [0, 0, 0, 1, 1, 1], [0], [0]>} : vector<1x8x8xbf16>, vector<1x8x8xbf16>, vector<1x8x8xf32> -> vector<1x8x8xf32>
    "tpu.trace_stop"() : () -> ()
    %56 = vector.shape_cast %48 : vector<8x8xf32> to vector<1x8x8xf32>
    %57 = arith.addf %55, %56 : vector<1x8x8xf32>
    %cst_20 = arith.constant dense<0xFF800000> : vector<1x8xf32>
    %58 = vector.multi_reduction <maximumf>, %57, %cst_20 [2] : vector<1x8x8xf32> to vector<1x8xf32>
    %59 = vector.shape_cast %58 : vector<1x8xf32> to vector<1x8x1xf32>
    %60 = vector.broadcast %59 : vector<1x8x1xf32> to vector<1x8x8xf32>
    %61 = arith.subf %57, %60 : vector<1x8x8xf32>
    %62 = math.exp %61 : vector<1x8x8xf32>
    %cst_21 = arith.constant dense<0.000000e+00> : vector<1x8xf32>
    %63 = vector.multi_reduction <add>, %62, %cst_21 [2] : vector<1x8x8xf32> to vector<1x8xf32>
    %64 = vector.shape_cast %63 : vector<1x8xf32> to vector<1x8x1xf32>
    %65 = vector.broadcast %64 : vector<1x8x1xf32> to vector<1x8x8xf32>
    %66 = arith.divf %62, %65 : vector<1x8x8xf32>
    %67 = arith.truncf %66 : vector<1x8x8xf32> to vector<1x8x8xbf16>
    "tpu.trace_start"() <{level = 10 : i32, message = "bqk,bkd->bqd"}> : () -> ()
    %cst_22 = arith.constant dense<0.000000e+00> : vector<1x8x8xf32>
    %68 = tpu.matmul %67, %54, %cst_22 {dimension_numbers = #tpu.dot_dimension_numbers<[2], [1], [1], [2], [0, 0, 0, 1, 1, 2], [0], [0]>} : vector<1x8x8xbf16>, vector<1x8x8xbf16>, vector<1x8x8xf32> -> vector<1x8x8xf32>
    "tpu.trace_stop"() : () -> ()
    %69 = vector.shape_cast %68 : vector<1x8x8xf32> to vector<8x8xf32>
    %70 = arith.truncf %69 : vector<8x8xf32> to vector<8x8xbf16>
    %c0_23 = arith.constant 0 : index
    %c0_24 = arith.constant 0 : index
    %71 = vector.load %arg16[%c0_23, %c0_24] : memref<8x32xbf16, #tpu.memory_space<vmem>>, vector<8x8xbf16>
    tpu.vector_store %arg16[%c0_23, %c0_24], %70 {strides = array<i32>} : memref<8x32xbf16, #tpu.memory_space<vmem>>, vector<8x8xbf16>,
    %72 = vector.extract_strided_slice %45 {offsets = [0, 0, 8], sizes = [1, 8, 8], strides = [1, 1, 1]} : vector<1x8x32xf32> to vector<1x8x8xf32>
    %73 = arith.truncf %72 : vector<1x8x8xf32> to vector<1x8x8xbf16>
    %74 = vector.extract_strided_slice %46 {offsets = [0, 0, 8], sizes = [1, 8, 8], strides = [1, 1, 1]} : vector<1x8x32xf32> to vector<1x8x8xf32>
    %75 = arith.truncf %74 : vector<1x8x8xf32> to vector<1x8x8xbf16>
    %76 = vector.extract_strided_slice %47 {offsets = [0, 0, 8], sizes = [1, 8, 8], strides = [1, 1, 1]} : vector<1x8x32xf32> to vector<1x8x8xf32>
    %77 = arith.truncf %76 : vector<1x8x8xf32> to vector<1x8x8xbf16>
    "tpu.trace_start"() <{level = 10 : i32, message = "bqd,bkd->bqk"}> : () -> ()
    %cst_25 = arith.constant dense<0.000000e+00> : vector<1x8x8xf32>
    %78 = tpu.matmul %73, %75, %cst_25 {dimension_numbers = #tpu.dot_dimension_numbers<[2], [2], [1], [1], [0, 0, 0, 1, 1, 1], [0], [0]>} : vector<1x8x8xbf16>, vector<1x8x8xbf16>, vector<1x8x8xf32> -> vector<1x8x8xf32>
    "tpu.trace_stop"() : () -> ()
    %79 = vector.shape_cast %48 : vector<8x8xf32> to vector<1x8x8xf32>
    %80 = arith.addf %78, %79 : vector<1x8x8xf32>
    %cst_26 = arith.constant dense<0xFF800000> : vector<1x8xf32>
    %81 = vector.multi_reduction <maximumf>, %80, %cst_26 [2] : vector<1x8x8xf32> to vector<1x8xf32>
    %82 = vector.shape_cast %81 : vector<1x8xf32> to vector<1x8x1xf32>
    %83 = vector.broadcast %82 : vector<1x8x1xf32> to vector<1x8x8xf32>
    %84 = arith.subf %80, %83 : vector<1x8x8xf32>
    %85 = math.exp %84 : vector<1x8x8xf32>
    %cst_27 = arith.constant dense<0.000000e+00> : vector<1x8xf32>
    %86 = vector.multi_reduction <add>, %85, %cst_27 [2] : vector<1x8x8xf32> to vector<1x8xf32>
    %87 = vector.shape_cast %86 : vector<1x8xf32> to vector<1x8x1xf32>
    %88 = vector.broadcast %87 : vector<1x8x1xf32> to vector<1x8x8xf32>
    %89 = arith.divf %85, %88 : vector<1x8x8xf32>
    %90 = arith.truncf %89 : vector<1x8x8xf32> to vector<1x8x8xbf16>
    "tpu.trace_start"() <{level = 10 : i32, message = "bqk,bkd->bqd"}> : () -> ()
    %cst_28 = arith.constant dense<0.000000e+00> : vector<1x8x8xf32>
    %91 = tpu.matmul %90, %77, %cst_28 {dimension_numbers = #tpu.dot_dimension_numbers<[2], [1], [1], [2], [0, 0, 0, 1, 1, 2], [0], [0]>} : vector<1x8x8xbf16>, vector<1x8x8xbf16>, vector<1x8x8xf32> -> vector<1x8x8xf32>
    "tpu.trace_stop"() : () -> ()
    %92 = vector.shape_cast %91 : vector<1x8x8xf32> to vector<8x8xf32>
    %93 = arith.truncf %92 : vector<8x8xf32> to vector<8x8xbf16>
    %c0_29 = arith.constant 0 : index
    %c8 = arith.constant 8 : index
    %94 = vector.load %arg16[%c0_29, %c8] : memref<8x32xbf16, #tpu.memory_space<vmem>>, vector<8x8xbf16>
    tpu.vector_store %arg16[%c0_29, %c8], %93 {strides = array<i32>} : memref<8x32xbf16, #tpu.memory_space<vmem>>, vector<8x8xbf16>,
    %95 = vector.extract_strided_slice %45 {offsets = [0, 0, 16], sizes = [1, 8, 8], strides = [1, 1, 1]} : vector<1x8x32xf32> to vector<1x8x8xf32>
    %96 = arith.truncf %95 : vector<1x8x8xf32> to vector<1x8x8xbf16>
    %97 = vector.extract_strided_slice %46 {offsets = [0, 0, 16], sizes = [1, 8, 8], strides = [1, 1, 1]} : vector<1x8x32xf32> to vector<1x8x8xf32>
    %98 = arith.truncf %97 : vector<1x8x8xf32> to vector<1x8x8xbf16>
    %99 = vector.extract_strided_slice %47 {offsets = [0, 0, 16], sizes = [1, 8, 8], strides = [1, 1, 1]} : vector<1x8x32xf32> to vector<1x8x8xf32>
    %100 = arith.truncf %99 : vector<1x8x8xf32> to vector<1x8x8xbf16>
    "tpu.trace_start"() <{level = 10 : i32, message = "bqd,bkd->bqk"}> : () -> ()
    %cst_30 = arith.constant dense<0.000000e+00> : vector<1x8x8xf32>
    %101 = tpu.matmul %96, %98, %cst_30 {dimension_numbers = #tpu.dot_dimension_numbers<[2], [2], [1], [1], [0, 0, 0, 1, 1, 1], [0], [0]>} : vector<1x8x8xbf16>, vector<1x8x8xbf16>, vector<1x8x8xf32> -> vector<1x8x8xf32>
    "tpu.trace_stop"() : () -> ()
    %102 = vector.shape_cast %48 : vector<8x8xf32> to vector<1x8x8xf32>
    %103 = arith.addf %101, %102 : vector<1x8x8xf32>
    %cst_31 = arith.constant dense<0xFF800000> : vector<1x8xf32>
    %104 = vector.multi_reduction <maximumf>, %103, %cst_31 [2] : vector<1x8x8xf32> to vector<1x8xf32>
    %105 = vector.shape_cast %104 : vector<1x8xf32> to vector<1x8x1xf32>
    %106 = vector.broadcast %105 : vector<1x8x1xf32> to vector<1x8x8xf32>
    %107 = arith.subf %103, %106 : vector<1x8x8xf32>
    %108 = math.exp %107 : vector<1x8x8xf32>
    %cst_32 = arith.constant dense<0.000000e+00> : vector<1x8xf32>
    %109 = vector.multi_reduction <add>, %108, %cst_32 [2] : vector<1x8x8xf32> to vector<1x8xf32>
    %110 = vector.shape_cast %109 : vector<1x8xf32> to vector<1x8x1xf32>
    %111 = vector.broadcast %110 : vector<1x8x1xf32> to vector<1x8x8xf32>
    %112 = arith.divf %108, %111 : vector<1x8x8xf32>
    %113 = arith.truncf %112 : vector<1x8x8xf32> to vector<1x8x8xbf16>
    "tpu.trace_start"() <{level = 10 : i32, message = "bqk,bkd->bqd"}> : () -> ()
    %cst_33 = arith.constant dense<0.000000e+00> : vector<1x8x8xf32>
    %114 = tpu.matmul %113, %100, %cst_33 {dimension_numbers = #tpu.dot_dimension_numbers<[2], [1], [1], [2], [0, 0, 0, 1, 1, 2], [0], [0]>} : vector<1x8x8xbf16>, vector<1x8x8xbf16>, vector<1x8x8xf32> -> vector<1x8x8xf32>
    "tpu.trace_stop"() : () -> ()
    %115 = vector.shape_cast %114 : vector<1x8x8xf32> to vector<8x8xf32>
    %116 = arith.truncf %115 : vector<8x8xf32> to vector<8x8xbf16>
    %c0_34 = arith.constant 0 : index
    %c16 = arith.constant 16 : index
    %117 = vector.load %arg16[%c0_34, %c16] : memref<8x32xbf16, #tpu.memory_space<vmem>>, vector<8x8xbf16>
    tpu.vector_store %arg16[%c0_34, %c16], %116 {strides = array<i32>} : memref<8x32xbf16, #tpu.memory_space<vmem>>, vector<8x8xbf16>,
    %118 = vector.extract_strided_slice %45 {offsets = [0, 0, 24], sizes = [1, 8, 8], strides = [1, 1, 1]} : vector<1x8x32xf32> to vector<1x8x8xf32>
    %119 = arith.truncf %118 : vector<1x8x8xf32> to vector<1x8x8xbf16>
    %120 = vector.extract_strided_slice %46 {offsets = [0, 0, 24], sizes = [1, 8, 8], strides = [1, 1, 1]} : vector<1x8x32xf32> to vector<1x8x8xf32>
    %121 = arith.truncf %120 : vector<1x8x8xf32> to vector<1x8x8xbf16>
    %122 = vector.extract_strided_slice %47 {offsets = [0, 0, 24], sizes = [1, 8, 8], strides = [1, 1, 1]} : vector<1x8x32xf32> to vector<1x8x8xf32>
    %123 = arith.truncf %122 : vector<1x8x8xf32> to vector<1x8x8xbf16>
    "tpu.trace_start"() <{level = 10 : i32, message = "bqd,bkd->bqk"}> : () -> ()
    %cst_35 = arith.constant dense<0.000000e+00> : vector<1x8x8xf32>
    %124 = tpu.matmul %119, %121, %cst_35 {dimension_numbers = #tpu.dot_dimension_numbers<[2], [2], [1], [1], [0, 0, 0, 1, 1, 1], [0], [0]>} : vector<1x8x8xbf16>, vector<1x8x8xbf16>, vector<1x8x8xf32> -> vector<1x8x8xf32>
    "tpu.trace_stop"() : () -> ()
    %125 = vector.shape_cast %48 : vector<8x8xf32> to vector<1x8x8xf32>
    %126 = arith.addf %124, %125 : vector<1x8x8xf32>
    %cst_36 = arith.constant dense<0xFF800000> : vector<1x8xf32>
    %127 = vector.multi_reduction <maximumf>, %126, %cst_36 [2] : vector<1x8x8xf32> to vector<1x8xf32>
    %128 = vector.shape_cast %127 : vector<1x8xf32> to vector<1x8x1xf32>
    %129 = vector.broadcast %128 : vector<1x8x1xf32> to vector<1x8x8xf32>
    %130 = arith.subf %126, %129 : vector<1x8x8xf32>
    %131 = math.exp %130 : vector<1x8x8xf32>
    %cst_37 = arith.constant dense<0.000000e+00> : vector<1x8xf32>
    %132 = vector.multi_reduction <add>, %131, %cst_37 [2] : vector<1x8x8xf32> to vector<1x8xf32>
    %133 = vector.shape_cast %132 : vector<1x8xf32> to vector<1x8x1xf32>
    %134 = vector.broadcast %133 : vector<1x8x1xf32> to vector<1x8x8xf32>
    %135 = arith.divf %131, %134 : vector<1x8x8xf32>
    %136 = arith.truncf %135 : vector<1x8x8xf32> to vector<1x8x8xbf16>
    "tpu.trace_start"() <{level = 10 : i32, message = "bqk,bkd->bqd"}> : () -> ()
    %cst_38 = arith.constant dense<0.000000e+00> : vector<1x8x8xf32>
    %137 = tpu.matmul %136, %123, %cst_38 {dimension_numbers = #tpu.dot_dimension_numbers<[2], [1], [1], [2], [0, 0, 0, 1, 1, 2], [0], [0]>} : vector<1x8x8xbf16>, vector<1x8x8xbf16>, vector<1x8x8xf32> -> vector<1x8x8xf32>
    "tpu.trace_stop"() : () -> ()
    %138 = vector.shape_cast %137 : vector<1x8x8xf32> to vector<8x8xf32>
    %139 = arith.truncf %138 : vector<8x8xf32> to vector<8x8xbf16>
    %c0_39 = arith.constant 0 : index
    %c24 = arith.constant 24 : index
    %140 = vector.load %arg16[%c0_39, %c24] : memref<8x32xbf16, #tpu.memory_space<vmem>>, vector<8x8xbf16>
    tpu.vector_store %arg16[%c0_39, %c24], %139 {strides = array<i32>} : memref<8x32xbf16, #tpu.memory_space<vmem>>, vector<8x8xbf16>,
    %c0_40 = arith.constant 0 : index
    %c0_41 = arith.constant 0 : index
    %141 = vector.load %arg16[%c0_40, %c0_41] : memref<8x32xbf16, #tpu.memory_space<vmem>>, vector<8x32xbf16>
    %c0_42 = arith.constant 0 : index
    %c0_43 = arith.constant 0 : index
    %c0_44 = arith.constant 0 : index
    %142 = vector.load %arg7[%c0_42, %c0_43, %c0_44] : memref<1x32x32xbf16, #tpu.memory_space<vmem>>, vector<1x32x32xbf16>
    %143 = vector.shape_cast %142 : vector<1x32x32xbf16> to vector<32x32xbf16>
    %cst_45 = arith.constant dense<0.000000e+00> : vector<8x32xf32>
    %144 = tpu.matmul %141, %143, %cst_45 {dimension_numbers = #tpu.dot_dimension_numbers<[1], [0], [0], [1], [0, 0, 1, 1], [], []>} : vector<8x32xbf16>, vector<32x32xbf16>, vector<8x32xf32> -> vector<8x32xf32>
    %c0_46 = arith.constant 0 : index
    %c0_47 = arith.constant 0 : index
    %c0_48 = arith.constant 0 : index
    %145 = vector.load %arg8[%c0_46, %c0_47, %c0_48] : memref<1x1x32xf32, #tpu.memory_space<vmem>>, vector<1x1x32xf32>
    %146 = vector.shape_cast %145 : vector<1x1x32xf32> to vector<32xf32>
    %147 = vector.shape_cast %146 : vector<32xf32> to vector<1x32xf32>
    %148 = vector.broadcast %147 : vector<1x32xf32> to vector<8x32xf32>
    %149 = arith.addf %144, %148 : vector<8x32xf32>
    %150 = vector.shape_cast %149 : vector<8x32xf32> to vector<1x8x32xf32>
    %151 = arith.addf %3, %150 : vector<1x8x32xf32>
    %c0_49 = arith.constant 0 : index
    %c0_50 = arith.constant 0 : index
    %c0_51 = arith.constant 0 : index
    %152 = vector.load %arg9[%c0_49, %c0_50, %c0_51] : memref<1x2x32xf32, #tpu.memory_space<vmem>>, vector<1x2x32xf32>
    %153 = vector.shape_cast %152 : vector<1x2x32xf32> to vector<2x32xf32>
    %154 = vector.extract_strided_slice %153 {offsets = [0, 0], sizes = [1, 32], strides = [1, 1]} : vector<2x32xf32> to vector<1x32xf32>
    %155 = vector.shape_cast %154 : vector<1x32xf32> to vector<32xf32>
    %156 = vector.extract_strided_slice %153 {offsets = [1, 0], sizes = [1, 32], strides = [1, 1]} : vector<2x32xf32> to vector<1x32xf32>
    %157 = vector.shape_cast %156 : vector<1x32xf32> to vector<32xf32>
    %cst_52 = arith.constant dense<0.000000e+00> : vector<1x8xf32>
    %158 = vector.multi_reduction <add>, %151, %cst_52 [2] : vector<1x8x32xf32> to vector<1x8xf32>
    %159 = vector.shape_cast %158 : vector<1x8xf32> to vector<1x8x1xf32>
    %cst_53 = arith.constant 3.200000e+01 : f32
    %160 = vector.broadcast %cst_53 : f32 to vector<1x8x1xf32>
    %161 = arith.divf %159, %160 : vector<1x8x1xf32>
    %162 = vector.broadcast %161 : vector<1x8x1xf32> to vector<1x8x32xf32>
    %163 = arith.subf %151, %162 : vector<1x8x32xf32>
    %164 = arith.mulf %163, %163 : vector<1x8x32xf32>
    %cst_54 = arith.constant dense<0.000000e+00> : vector<1x8xf32>
    %165 = vector.multi_reduction <add>, %164, %cst_54 [2] : vector<1x8x32xf32> to vector<1x8xf32>
    %166 = vector.shape_cast %165 : vector<1x8xf32> to vector<1x8x1xf32>
    %cst_55 = arith.constant 3.200000e+01 : f32
    %167 = vector.broadcast %cst_55 : f32 to vector<1x8x1xf32>
    %168 = arith.divf %166, %167 : vector<1x8x1xf32>
    %169 = vector.broadcast %161 : vector<1x8x1xf32> to vector<1x8x32xf32>
    %170 = arith.subf %151, %169 : vector<1x8x32xf32>
    %cst_56 = arith.constant 9.99999974E-6 : f32
    %171 = vector.broadcast %cst_56 : f32 to vector<1x8x1xf32>
    %172 = arith.addf %168, %171 : vector<1x8x1xf32>
    %173 = math.rsqrt %172 : vector<1x8x1xf32>
    %174 = vector.broadcast %173 : vector<1x8x1xf32> to vector<1x8x32xf32>
    %175 = arith.mulf %170, %174 : vector<1x8x32xf32>
    %176 = vector.shape_cast %155 : vector<32xf32> to vector<1x1x32xf32>
    %177 = vector.broadcast %176 : vector<1x1x32xf32> to vector<1x8x32xf32>
    %178 = arith.mulf %175, %177 : vector<1x8x32xf32>
    %179 = vector.shape_cast %157 : vector<32xf32> to vector<1x1x32xf32>
    %180 = vector.broadcast %179 : vector<1x1x32xf32> to vector<1x8x32xf32>
    %181 = arith.addf %178, %180 : vector<1x8x32xf32>
    %182 = vector.shape_cast %181 : vector<1x8x32xf32> to vector<8x32xf32>
    %183 = arith.truncf %182 : vector<8x32xf32> to vector<8x32xbf16>
    %c0_57 = arith.constant 0 : index
    %c0_58 = arith.constant 0 : index
    %c0_59 = arith.constant 0 : index
    %184 = vector.load %arg10[%c0_57, %c0_58, %c0_59] : memref<1x32x64xbf16, #tpu.memory_space<vmem>>, vector<1x32x64xbf16>
    %185 = vector.shape_cast %184 : vector<1x32x64xbf16> to vector<32x64xbf16>
    %cst_60 = arith.constant dense<0.000000e+00> : vector<8x64xf32>
    %186 = tpu.matmul %183, %185, %cst_60 {dimension_numbers = #tpu.dot_dimension_numbers<[1], [0], [0], [1], [0, 0, 1, 1], [], []>} : vector<8x32xbf16>, vector<32x64xbf16>, vector<8x64xf32> -> vector<8x64xf32>
    %c0_61 = arith.constant 0 : index
    %c0_62 = arith.constant 0 : index
    %c0_63 = arith.constant 0 : index
    %187 = vector.load %arg11[%c0_61, %c0_62, %c0_63] : memref<1x1x64xf32, #tpu.memory_space<vmem>>, vector<1x1x64xf32>
    %188 = vector.shape_cast %187 : vector<1x1x64xf32> to vector<64xf32>
    %189 = vector.shape_cast %188 : vector<64xf32> to vector<1x64xf32>
    %190 = vector.broadcast %189 : vector<1x64xf32> to vector<8x64xf32>
    %191 = arith.addf %186, %190 : vector<8x64xf32>
    %192 = arith.truncf %191 : vector<8x64xf32> to vector<8x64xbf16>
    %cst_64 = arith.constant -1.703130e+00 : bf16
    %193 = vector.broadcast %cst_64 : bf16 to vector<8x64xbf16>
    %194 = arith.mulf %193, %192 : vector<8x64xbf16>
    %195 = math.exp %194 : vector<8x64xbf16>
    %cst_65 = arith.constant 1.000000e+00 : bf16
    %196 = vector.broadcast %cst_65 : bf16 to vector<8x64xbf16>
    %197 = arith.addf %196, %195 : vector<8x64xbf16>
    %cst_66 = arith.constant 1.000000e+00 : bf16
    %198 = vector.broadcast %cst_66 : bf16 to vector<8x64xbf16>
    %199 = arith.divf %198, %197 : vector<8x64xbf16>
    %200 = arith.mulf %192, %199 : vector<8x64xbf16>
    %c0_67 = arith.constant 0 : index
    %c0_68 = arith.constant 0 : index
    %c0_69 = arith.constant 0 : index
    %201 = vector.load %arg12[%c0_67, %c0_68, %c0_69] : memref<1x64x32xbf16, #tpu.memory_space<vmem>>, vector<1x64x32xbf16>
    %202 = vector.shape_cast %201 : vector<1x64x32xbf16> to vector<64x32xbf16>
    %cst_70 = arith.constant dense<0.000000e+00> : vector<8x32xf32>
    %203 = tpu.matmul %200, %202, %cst_70 {dimension_numbers = #tpu.dot_dimension_numbers<[1], [0], [0], [1], [0, 0, 1, 1], [], []>} : vector<8x64xbf16>, vector<64x32xbf16>, vector<8x32xf32> -> vector<8x32xf32>
    %c0_71 = arith.constant 0 : index
    %c0_72 = arith.constant 0 : index
    %c0_73 = arith.constant 0 : index
    %204 = vector.load %arg13[%c0_71, %c0_72, %c0_73] : memref<1x1x32xf32, #tpu.memory_space<vmem>>, vector<1x1x32xf32>
    %205 = vector.shape_cast %204 : vector<1x1x32xf32> to vector<32xf32>
    %206 = vector.shape_cast %205 : vector<32xf32> to vector<1x32xf32>
    %207 = vector.broadcast %206 : vector<1x32xf32> to vector<8x32xf32>
    %208 = arith.addf %203, %207 : vector<8x32xf32>
    %209 = vector.shape_cast %208 : vector<8x32xf32> to vector<1x8x32xf32>
    %210 = arith.addf %151, %209 : vector<1x8x32xf32>
    %c1_i32 = arith.constant 1 : i32
    %211 = arith.cmpi slt, %arg1, %c1_i32 : i32
    %212 = arith.extui %211 : i1 to i32
    %c0_i32_74 = arith.constant 0 : i32
    %213 = arith.cmpi ne, %212, %c0_i32_74 : i32
    scf.if %213 {
      %c0_77 = arith.constant 0 : index
      %c0_78 = arith.constant 0 : index
      %c0_79 = arith.constant 0 : index
      %217 = vector.load %arg15[%c0_77, %c0_78, %c0_79] : memref<1x8x32xf32, #tpu.memory_space<vmem>>, vector<1x8x32xf32>
      tpu.vector_store %arg15[%c0_77, %c0_78, %c0_79], %210 {strides = array<i32>} : memref<1x8x32xf32, #tpu.memory_space<vmem>>, vector<1x8x32xf32>,
    } else {
    }
    %c1_i32_75 = arith.constant 1 : i32
    %214 = arith.cmpi eq, %arg1, %c1_i32_75 : i32
    %215 = arith.extui %214 : i1 to i32
    %c0_i32_76 = arith.constant 0 : i32
    %216 = arith.cmpi ne, %215, %c0_i32_76 : i32
    scf.if %216 {
      %c0_77 = arith.constant 0 : index
      %c0_78 = arith.constant 0 : index
      %217 = vector.load %arg14[%c0_77, %c0_78] : memref<2x32xf32, #tpu.memory_space<vmem>>, vector<2x32xf32>
      %218 = vector.extract_strided_slice %217 {offsets = [0, 0], sizes = [1, 32], strides = [1, 1]} : vector<2x32xf32> to vector<1x32xf32>
      %219 = vector.shape_cast %218 : vector<1x32xf32> to vector<32xf32>
      %220 = vector.extract_strided_slice %217 {offsets = [1, 0], sizes = [1, 32], strides = [1, 1]} : vector<2x32xf32> to vector<1x32xf32>
      %221 = vector.shape_cast %220 : vector<1x32xf32> to vector<32xf32>
      %cst_79 = arith.constant dense<0.000000e+00> : vector<1x8xf32>
      %222 = vector.multi_reduction <add>, %210, %cst_79 [2] : vector<1x8x32xf32> to vector<1x8xf32>
      %223 = vector.shape_cast %222 : vector<1x8xf32> to vector<1x8x1xf32>
      %cst_80 = arith.constant 3.200000e+01 : f32
      %224 = vector.broadcast %cst_80 : f32 to vector<1x8x1xf32>
      %225 = arith.divf %223, %224 : vector<1x8x1xf32>
      %226 = vector.broadcast %225 : vector<1x8x1xf32> to vector<1x8x32xf32>
      %227 = arith.subf %210, %226 : vector<1x8x32xf32>
      %228 = arith.mulf %227, %227 : vector<1x8x32xf32>
      %cst_81 = arith.constant dense<0.000000e+00> : vector<1x8xf32>
      %229 = vector.multi_reduction <add>, %228, %cst_81 [2] : vector<1x8x32xf32> to vector<1x8xf32>
      %230 = vector.shape_cast %229 : vector<1x8xf32> to vector<1x8x1xf32>
      %cst_82 = arith.constant 3.200000e+01 : f32
      %231 = vector.broadcast %cst_82 : f32 to vector<1x8x1xf32>
      %232 = arith.divf %230, %231 : vector<1x8x1xf32>
      %233 = vector.broadcast %225 : vector<1x8x1xf32> to vector<1x8x32xf32>
      %234 = arith.subf %210, %233 : vector<1x8x32xf32>
      %cst_83 = arith.constant 9.99999974E-6 : f32
      %235 = vector.broadcast %cst_83 : f32 to vector<1x8x1xf32>
      %236 = arith.addf %232, %235 : vector<1x8x1xf32>
      %237 = math.rsqrt %236 : vector<1x8x1xf32>
      %238 = vector.broadcast %237 : vector<1x8x1xf32> to vector<1x8x32xf32>
      %239 = arith.mulf %234, %238 : vector<1x8x32xf32>
      %240 = vector.shape_cast %219 : vector<32xf32> to vector<1x1x32xf32>
      %241 = vector.broadcast %240 : vector<1x1x32xf32> to vector<1x8x32xf32>
      %242 = arith.mulf %239, %241 : vector<1x8x32xf32>
      %243 = vector.shape_cast %221 : vector<32xf32> to vector<1x1x32xf32>
      %244 = vector.broadcast %243 : vector<1x1x32xf32> to vector<1x8x32xf32>
      %245 = arith.addf %242, %244 : vector<1x8x32xf32>
      %c0_84 = arith.constant 0 : index
      %c0_85 = arith.constant 0 : index
      %c0_86 = arith.constant 0 : index
      %246 = vector.load %arg15[%c0_84, %c0_85, %c0_86] : memref<1x8x32xf32, #tpu.memory_space<vmem>>, vector<1x8x32xf32>
      tpu.vector_store %arg15[%c0_84, %c0_85, %c0_86], %245 {strides = array<i32>} : memref<1x8x32xf32, #tpu.memory_space<vmem>>, vector<1x8x32xf32>,
    } else {
    }
    return
  }
  func.func @transform_0(%arg0: i32, %arg1: i32) -> (i32, i32, i32) {
    %c0_i32 = arith.constant 0 : i32
    %c0_i32_0 = arith.constant 0 : i32
    %c0_i32_1 = arith.constant 0 : i32
    return %arg0, %c0_i32, %c0_i32_0 : i32, i32, i32
  }
  func.func @transform_1(%arg0: i32, %arg1: i32) -> (i32, i32) {
    %c0_i32 = arith.constant 0 : i32
    %c0_i32_0 = arith.constant 0 : i32
    %c0_i32_1 = arith.constant 0 : i32
    return %c0_i32, %c0_i32_0 : i32, i32
  }
  func.func @transform_2(%arg0: i32, %arg1: i32) -> (i32, i32, i32) {
    %c0_i32 = arith.constant 0 : i32
    %c0_i32_0 = arith.constant 0 : i32
    %c0_i32_1 = arith.constant 0 : i32
    return %arg1, %c0_i32, %c0_i32_0 : i32, i32, i32
  }
  func.func @transform_3(%arg0: i32, %arg1: i32) -> (i32, i32, i32) {
    %c0_i32 = arith.constant 0 : i32
    %c0_i32_0 = arith.constant 0 : i32
    %c0_i32_1 = arith.constant 0 : i32
    return %arg1, %c0_i32, %c0_i32_0 : i32, i32, i32
  }
  func.func @transform_4(%arg0: i32, %arg1: i32) -> (i32, i32, i32) {
    %c0_i32 = arith.constant 0 : i32
    %c0_i32_0 = arith.constant 0 : i32
    %c0_i32_1 = arith.constant 0 : i32
    return %arg1, %c0_i32, %c0_i32_0 : i32, i32, i32
  }
  func.func @transform_5(%arg0: i32, %arg1: i32) -> (i32, i32, i32) {
    %c0_i32 = arith.constant 0 : i32
    %c0_i32_0 = arith.constant 0 : i32
    %c0_i32_1 = arith.constant 0 : i32
    return %arg1, %c0_i32, %c0_i32_0 : i32, i32, i32
  }
  func.func @transform_6(%arg0: i32, %arg1: i32) -> (i32, i32, i32) {
    %c0_i32 = arith.constant 0 : i32
    %c0_i32_0 = arith.constant 0 : i32
    %c0_i32_1 = arith.constant 0 : i32
    return %arg1, %c0_i32, %c0_i32_0 : i32, i32, i32
  }
  func.func @transform_7(%arg0: i32, %arg1: i32) -> (i32, i32, i32) {
    %c0_i32 = arith.constant 0 : i32
    %c0_i32_0 = arith.constant 0 : i32
    %c0_i32_1 = arith.constant 0 : i32
    return %arg1, %c0_i32, %c0_i32_0 : i32, i32, i32
  }
  func.func @transform_8(%arg0: i32, %arg1: i32) -> (i32, i32, i32) {
    %c0_i32 = arith.constant 0 : i32
    %c0_i32_0 = arith.constant 0 : i32
    %c0_i32_1 = arith.constant 0 : i32
    return %arg1, %c0_i32, %c0_i32_0 : i32, i32, i32
  }
  func.func @transform_9(%arg0: i32, %arg1: i32) -> (i32, i32, i32) {
    %c0_i32 = arith.constant 0 : i32
    %c0_i32_0 = arith.constant 0 : i32
    %c0_i32_1 = arith.constant 0 : i32
    return %arg1, %c0_i32, %c0_i32_0 : i32, i32, i32
  }
  func.func @transform_10(%arg0: i32, %arg1: i32) -> (i32, i32, i32) {
    %c0_i32 = arith.constant 0 : i32
    %c0_i32_0 = arith.constant 0 : i32
    %c0_i32_1 = arith.constant 0 : i32
    return %arg1, %c0_i32, %c0_i32_0 : i32, i32, i32
  }
  func.func @transform_11(%arg0: i32, %arg1: i32) -> (i32, i32, i32) {
    %c0_i32 = arith.constant 0 : i32
    %c0_i32_0 = arith.constant 0 : i32
    %c0_i32_1 = arith.constant 0 : i32
    return %arg1, %c0_i32, %c0_i32_0 : i32, i32, i32
  }
  func.func @transform_12(%arg0: i32, %arg1: i32) -> (i32, i32) {
    %c0_i32 = arith.constant 0 : i32
    %c0_i32_0 = arith.constant 0 : i32
    %c0_i32_1 = arith.constant 0 : i32
    return %c0_i32, %c0_i32_0 : i32, i32
  }
  func.func @transform_13(%arg0: i32, %arg1: i32) -> (i32, i32, i32) {
    %c0_i32 = arith.constant 0 : i32
    %c0_i32_0 = arith.constant 0 : i32
    %c0_i32_1 = arith.constant 0 : i32
    return %arg0, %c0_i32, %c0_i32_0 : i32, i32, i32
  }
}

</mosaic_0001>

<bundles_post_ra>
// kernel: tpu_custom_call.1
= control target key start
LH: loop header
LB: loop body
LE: loop exit
PB: predicated region body
PF: predicated region fallthrough
CT: control target
= control target key end

     0   :  { %s3193_s0 = inlined_call_operand.hbm [shape: f32[2,8,32], index: 0, kind: input, shape index: {}]   ;;  %s3194_s1 = inlined_call_operand.hbm [shape: f32[8,8], index: 1, kind: input, shape index: {}]   ;;  %s3195_s2 = inlined_call_operand.vmem [shape: f32[2,2,32], index: 2, kind: input, shape index: {}]   ;;  %s3196_s3 = inlined_call_operand.vmem [shape: bf16[2,32,96], index: 3, kind: input, shape index: {}]   ;;  %s3197_s4 = inlined_call_operand.hbm [shape: f32[2,1,96], index: 4, kind: input, shape index: {}]   ;;  %s3198_s5 = inlined_call_operand.vmem [shape: bf16[2,32,32], index: 5, kind: input, shape index: {}]   ;;  %s3199_s6 = inlined_call_operand.hbm [shape: f32[2,1,32], index: 6, kind: input, shape index: {}]   ;;  %s3200_s7 = inlined_call_operand.hbm [shape: f32[2,2,32], index: 7, kind: input, shape index: {}]   ;;  %s3201_s8 = inlined_call_operand.vmem [shape: bf16[2,32,64], index: 8, kind: input, shape index: {}]   ;;  %s3202_s9 = inlined_call_operand.hbm [shape: f32[2,1,64], index: 9, kind: input, shape index: {}]   ;;  %s3203_s10 = inlined_call_operand.vmem [shape: bf16[2,64,32], index: 10, kind: input, shape index: {}]   ;;  %s3204_s11 = inlined_call_operand.vmem [shape: f32[2,1,32], index: 11, kind: input, shape index: {}]   ;;  %s3205_s12 = inlined_call_operand.vmem [shape: f32[2,32], index: 12, kind: input, shape index: {}]   ;;  %s3206_s13 = inlined_call_operand.hbm [shape: f32[2,8,32], index: 13, kind: output, shape index: {}]  }
   0x1   :  { %3227 = sst [smem:[#allocation29_spill]] %s3193_s0 }
   0x2   :  { %3228 = sst [smem:[#allocation30_spill]] %s3194_s1 }
   0x3   :  { %3229 = sst [smem:[#allocation31_spill]] %s3195_s2 }
   0x4   :  { %3230 = sst [smem:[#allocation32_spill]] %s3196_s3 }
   0x5   :  { %3231 = sst [smem:[#allocation33_spill]] %s3197_s4 }
   0x6   :  { %3232 = sst [smem:[#allocation34_spill]] %s3198_s5 }
   0x7   :  { %3233 = sst [smem:[#allocation35_spill]] %s3199_s6 }
   0x8   :  { %3234 = sst [smem:[#allocation36_spill]] %s3200_s7 }
   0x9   :  { %3235 = sst [smem:[#allocation37_spill]] %s3201_s8 }
   0xa   :  { %3236 = sst [smem:[#allocation38_spill]] %s3202_s9 }
   0xb   :  { %3237 = sst [smem:[#allocation39_spill]] %s3203_s10 }
   0xc   :  { %3238 = sst [smem:[#allocation40_spill]] %s3204_s11 }
   0xd   :  { %3239 = sst [smem:[#allocation41_spill]] %s3205_s12 }
   0xe   :  { %3240 = sst [smem:[#allocation42_spill]] %s3206_s13 }
   0xf   :  { %18 = vsyncpa [#allocation4], 0 }
  0x10   :  { %20 = vsyncpa [#allocation4 + $0x1], 0 }
  0x11   :  { %21 = vsyncpa [#allocation7], 0 }
  0x12   :  { %22 = vsyncpa [#allocation5], 0 }
  0x13   :  { %24 = vsyncpa [#allocation5 + $0x1], 0  ;;  %s2598_s25 = smov 0   ;;  %s2600_s26 = smov 0  }
  0x14   :  { %s2602_s27 = smov 0   ;;  %s2604_s28 = smov 0  }
  0x15   :  { %s2606_s29 = smov 0   ;;  %s2608_s30 = smov 0  }
  0x16   :  { %s2610_s14 = smov 0   ;;  %s2612_s15 = smov 0  }
  0x17   :  { %s2614_s16 = smov 0   ;;  %s2616_s17 = smov 0  }
  0x18   :  { %s2618_s18 = smov 0  }
  0x19 LB: > { %3241 = sst [smem:[#allocation17_spill]] %s2467_s26  ;;  %s39_s19 = sadd.s32 1, %s2495_s16  ;;  %s2503_s18 = sphi %s2618_s18, %s30_s18   ;;  %s2499_s17 = sphi %s2616_s17, %s3305_s17   ;;  %s2495_s16 = sphi %s2614_s16, %s3309_s16   ;;  %s2491_s15 = sphi %s2612_s15, %s3308_s15   ;;  %s2487_s14 = sphi %s2610_s14, %s3302_s14   ;;  %s2483_s30 = sphi %s2608_s30, %s3301_s30   ;;  %s2479_s29 = sphi %s2606_s29, %s3307_s29   ;;  %s2475_s28 = sphi %s2604_s28, %s3306_s28   ;;  %s2471_s27 = sphi %s2602_s27, %s3299_s27   ;;  %s2467_s26 = sphi %s2600_s26, %s3298_s26   ;;  %s2463_s25 = sphi %s2598_s25, %s3297_s25  }
  0x1a   : > { %3242 = sst [smem:[#allocation18_spill]] %s2471_s27  ;;  %s42_s20 = sadd.s32 1, %s2499_s17 }
  0x1b   : > { %3243 = sst [smem:[#allocation19_spill]] %s2475_s28  ;;  %p40_p0 = scmp.ge.s32.totalorder %s39_s19, 2 }
  0x1c   : > { %3244 = sst [smem:[#allocation20_spill]] %s2483_s30  ;;  %s49_s21 = sadd.s32 1, %s2483_s30 }
  0x1d   : > { %3245 = sst [smem:[#allocation21_spill]] %s2491_s15  ;;  %p3210_p1 = scmp.ne.s32.totalorder %s2483_s30, %s2479_s29 }
  0x1e   : > { %3246 = sst [smem:[#allocation22_spill]] %s2495_s16  ;;  %p57_p2 = scmp.eq.s32.totalorder %s2503_s18, 0 }
  0x1f   : > { %3247 = sst [smem:[#allocation23_spill]] %s2499_s17  ;;  %s3311_s19 = smov (%p40_p0, %s39_s19), 0 }
  0x20   : > { %3248 = sst [smem:[#allocation24_spill]] %s3311_s19  ;;  %s3313_s20 = smov (!%p40_p0, %s42_s20), %s2499_s17 }
  0x21   : > { %p2665_p3 = por %p57_p2, %p3210_p1  ;;  %s145_s23 = ssub.s32 %s2495_s16, %s3311_s19 }
  0x22   : > { %p44_p4 = scmp.ge.s32.totalorder %s3313_s20, 2  ;;  %p146_p5 = scmp.eq.s32.totalorder %s145_s23, 0 }
  0x23   : > { %s148_s24 = sadd.s32 1, %s2471_s27  ;;  %p155_p6 = scmp.ne.s32.totalorder %s2471_s27, %s2467_s26 }
  0x24   : > { %s3315_s20 = smov (%p44_p4, %s3313_s20), 0  ;;  %p2051_p9 = scmp.lt.s32.totalorder %s2503_s18, 4 }
  0x25   : > { %3250 = sst [smem:[#allocation25_spill]] %s3315_s20  ;;  %s46_s15 = ssub.s32 %s2499_s17, %s3315_s20 }
  0x26   : > { %s2677_s13 = scalar_select %p146_p5, %s2471_s27, %s148_s24  }
  0x27   : > { %p2681_p7 = por %p155_p6, %p57_p2  ;;  %p47_p8 = scmp.eq.s32.totalorder %s46_s15, 0 }
  0x28   : > { %3251 = sst [smem:[#allocation26_spill]] %s2677_s13  ;;  %s428_s19 = sand.u32 1, %s2503_s18  }
  0x29   : > { %s2688_s10 = scalar_select %p47_p8, %s2483_s30, %s49_s21  }
  0x2a   : > { %s430_s23 = sand.u32 1, %s2483_s30   ;;  %s1833_s8 = sshll.u32 %s2499_s17, 7 }
  0x2b   : > { %3253 = sst [smem:[#allocation27_spill]] %s2688_s10  ;;  %s1832_s11 = sshll.u32 %s430_s23, 3 }
  0x2c   : > { %s3254_s0 = sld [smem:[#allocation29_spill]]  ;;  %s432_s20 = scalar_lea.vmem [#allocation3], %s1832_s11 }
  0x2d   : > { %s439_s13 = sshll.u32 %s432_s20, 4  ;;  %p2699_p10 = pnand %p2051_p9, %p2665_p3  ;;  %s2703_s13 = int_to_ptr.vmem [resolvable:$true] %s439_s13 }
  0x2e   : > { %p2707_p11 = pnand %p2051_p9, %p2681_p7  ;;  %s2712_s5 = sand.u32 1, %s2471_s27  }
  0x2f   : > { %p2197_p13 = pneg %p2699_p10 }
  0x30   : > { %s3256_s3 = scalar_select %p2707_p11, 1, 0 }
  0x32   : > { %s2695_s24 = scalar_lea.hbm %s3254_s0, %s1833_s8  ;;  %s2714_s8 = scalar_lea.sflag [#allocation4], %s428_s19 }
  0x33   : > { %s2195_s11 = scalar_lea.hbm %s2695_s24, 128  ;;  %s2200_s12 = scalar_lea.hbm %s3254_s0, 256 }
  0x34   : > { %p2196_p12 = scmp.ne.s32.totalorder %s2695_s24, %s2195_s11  ;;  %p2201_p3 = scmp.lt.u32.totalorder %s2695_s24, %s3254_s0 }
  0x35   : > { %p2202_p4 = scmp.lt.u32.totalorder %s2200_s12, %s2195_s11  ;;  %p2204_p6 = scmp.lt.u32.totalorder %s2195_s11, %s2695_s24 }
  0x36   : > { %p2198_p0 = pnand %p2197_p13, %p2196_p12 }
  0x37   : > { %p2203_p5 = por %p2202_p4, %p2201_p3 }
  0x38   : > { %p2199_p2 = pneg %p2198_p0 }
  0x39   : > { %p2205_p7 = por %p2204_p6, %p2203_p5 }
  0x3b   : > { %p2206_p8 = pnand %p2205_p7, %p2199_p2 }
  0x3d   : > { %2209 = shalt.err (!%p2206_p8)
}
  0x3e   : > { %s2210_s19 = scalar_lea.vmem %s2703_s13, 128  ;;  %s2505_s20 = smov [#allocation3]  }
  0x3f   : > { %p2211_p9 = scmp.ne.s32.totalorder %s2703_s13, %s2210_s19  ;;  %s2215_s21 = sshll.u32 %s2505_s20, 4  ;;  %s2216_s21 = int_to_ptr.vmem [resolvable:$false] %s2215_s21 }
  0x40   : > { %s2217_s22 = scalar_lea.vmem %s2216_s21, 256  ;;  %p2218_p1 = scmp.lt.s32.totalorder %s2703_s13, %s2216_s21 }
  0x41   : > { %p2213_p12 = pnand %p2211_p9, %p2197_p13  ;;  %p2219_p3 = scmp.lt.s32.totalorder %s2217_s22, %s2210_s19 }
  0x43   : > { %p2214_p0 = pneg %p2213_p12  ;;  %p2220_p4 = por %p2219_p3, %p2218_p1 }
  0x45   : > { %p2221_p5 = pnand %p2220_p4, %p2214_p0 }
  0x47   : > { %2224 = shalt.err (!%p2221_p5)
}
  0x48   : > { %2033 = dma.hbm_to_vmem [thread:$0]  (!%p2699_p10), %s2695_s24, 128, %s2703_s13, %s2714_s8  }
  0x49   : > { %s2743_s11 = sshll.u32 %s2495_s16, 4  ;;  %s464_s12 = scalar_lea.vmem [#allocation8], %s2712_s5 }
  0x4a   : > { %s471_s23 = sshll.u32 %s464_s12, 4  ;;  %s3257_s4 = sld [smem:[#allocation33_spill]]  ;;  %s472_s23 = int_to_ptr.vmem [resolvable:$true] %s471_s23 }
  0x4b   : > { %p2756_p13 = pneg %p2707_p11 }
  0x50   : > { %s2750_s19 = scalar_lea.hbm %s3257_s4, %s2743_s11  ;;  %s2230_s12 = scalar_lea.hbm %s3257_s4, 32 }
  0x51   : > { %s2225_s15 = scalar_lea.hbm %s2750_s19, 16  ;;  %p2231_p6 = scmp.lt.u32.totalorder %s2750_s19, %s3257_s4 }
  0x52   : > { %p2226_p1 = scmp.ne.s32.totalorder %s2750_s19, %s2225_s15  ;;  %p2232_p7 = scmp.lt.u32.totalorder %s2230_s12, %s2225_s15 }
  0x53   : > { %p2234_p9 = scmp.lt.u32.totalorder %s2225_s15, %s2750_s19 }
  0x54   : > { %p2228_p10 = pnand %p2756_p13, %p2226_p1  ;;  %p2233_p8 = por %p2232_p7, %p2231_p6 }
  0x56   : > { %p2229_p2 = pneg %p2228_p10  ;;  %p2235_p12 = por %p2234_p9, %p2233_p8 }
  0x58   : > { %p2236_p0 = pnand %p2235_p12, %p2229_p2 }
  0x5a   : > { %2239 = shalt.err (!%p2236_p0)
}
  0x5b   : > { %s2240_s0 = scalar_lea.vmem %s472_s23, 16  ;;  %s2506_s17 = smov [#allocation8]  }
  0x5c   : > { %p2241_p3 = scmp.ne.s32.totalorder %s472_s23, %s2240_s0  ;;  %s2245_s10 = sshll.u32 %s2506_s17, 4  ;;  %s2246_s10 = int_to_ptr.vmem [resolvable:$false] %s2245_s10 }
  0x5d   : > { %s2247_s24 = scalar_lea.vmem %s2246_s10, 32  ;;  %p2248_p1 = scmp.lt.s32.totalorder %s472_s23, %s2246_s10 }
  0x5e   : > { %p2243_p4 = pnand %p2241_p3, %p2756_p13  ;;  %p2249_p10 = scmp.lt.s32.totalorder %s2247_s24, %s2240_s0 }
  0x60   : > { %p2244_p5 = pneg %p2243_p4  ;;  %p2250_p11 = por %p2249_p10, %p2248_p1 }
  0x62   : > { %p2251_p6 = pnand %p2250_p11, %p2244_p5 }
  0x64   : > { %2254 = shalt.err (!%p2251_p6)
}
  0x65   : > { %p3259_p7 = scmp.ne.s32.totalorder %s3256_s3, 0  ;;  %s3260_s6 = sld [smem:[#allocation35_spill]] }
  0x66   : > { %s489_s0 = scalar_lea.vmem [#allocation9], %s2712_s5 }
  0x67   : > { %2036 = dma.hbm_to_vmem [thread:$0]  (!%p3259_p7), %s2750_s19, 16, %s472_s23, %s2714_s8  }
  0x68   : > { %s496_s10 = sshll.u32 %s489_s0, 4  ;;  %s497_s10 = int_to_ptr.vmem [resolvable:$true] %s496_s10 }
  0x6b   : > { %s2780_s17 = scalar_lea.hbm %s3260_s6, %s2743_s11  ;;  %s2260_s19 = scalar_lea.hbm %s3260_s6, 32 }
  0x6c   : > { %s2255_s20 = scalar_lea.hbm %s2780_s17, 16  ;;  %p2261_p9 = scmp.lt.u32.totalorder %s2780_s17, %s3260_s6 }
  0x6d   : > { %p2256_p11 = scmp.ne.s32.totalorder %s2780_s17, %s2255_s20  ;;  %p2262_p12 = scmp.lt.u32.totalorder %s2260_s19, %s2255_s20 }
  0x6e   : > { %p2264_p3 = scmp.lt.u32.totalorder %s2255_s20, %s2780_s17 }
  0x6f   : > { %p2258_p2 = pnand %p2256_p11, %p2756_p13  ;;  %p2263_p0 = por %p2262_p12, %p2261_p9 }
  0x71   : > { %p2259_p8 = pneg %p2258_p2  ;;  %p2265_p4 = por %p2264_p3, %p2263_p0 }
  0x73   : > { %p2266_p5 = pnand %p2265_p4, %p2259_p8 }
  0x75   : > { %2269 = shalt.err (!%p2266_p5)
}
  0x76   : > { %s2270_s22 = scalar_lea.vmem %s497_s10, 16  ;;  %s2507_s0 = smov [#allocation9]  }
  0x77   : > { %p2271_p1 = scmp.ne.s32.totalorder %s497_s10, %s2270_s22  ;;  %s2275_s12 = sshll.u32 %s2507_s0, 4  ;;  %s2276_s12 = int_to_ptr.vmem [resolvable:$false] %s2275_s12 }
  0x78   : > { %s2277_s21 = scalar_lea.vmem %s2276_s12, 32  ;;  %p2278_p11 = scmp.lt.s32.totalorder %s497_s10, %s2276_s12 }
  0x79   : > { %p2273_p10 = pnand %p2271_p1, %p2756_p13  ;;  %p2279_p2 = scmp.lt.s32.totalorder %s2277_s21, %s2270_s22 }
  0x7b   : > { %p2274_p6 = pneg %p2273_p10  ;;  %p2280_p7 = por %p2279_p2, %p2278_p11 }
  0x7d   : > { %p2281_p9 = pnand %p2280_p7, %p2274_p6 }
  0x7f   : > { %2284 = shalt.err (!%p2281_p9)
}
  0x80   : > { %p3261_p12 = scmp.ne.s32.totalorder %s3256_s3, 0  ;;  %s1837_s20 = sshll.u32 %s2495_s16, 5 }
  0x81   : > { %s3262_s23 = sshll.u32 %s2712_s5, 1  ;;  %s3263_s7 = sld [smem:[#allocation36_spill]] }
  0x82   : > { %2039 = dma.hbm_to_vmem [thread:$0]  (!%p3261_p12), %s2780_s17, 16, %s497_s10, %s2714_s8  }
  0x83   : > { %s507_s19 = scalar_lea.vmem [#allocation10], %s3262_s23 }
  0x84   : > { %s514_s24 = sshll.u32 %s507_s19, 4  ;;  %s515_s24 = int_to_ptr.vmem [resolvable:$true] %s514_s24 }
  0x87   : > { %s512_s12 = scalar_lea.hbm %s3263_s7, %s1837_s20  ;;  %s2290_s6 = scalar_lea.hbm %s3263_s7, 64 }
  0x88   : > { %s2285_s22 = scalar_lea.hbm %s512_s12, 32  ;;  %p2291_p3 = scmp.lt.u32.totalorder %s512_s12, %s3263_s7 }
  0x89   : > { %p2286_p7 = scmp.ne.s32.totalorder %s512_s12, %s2285_s22  ;;  %p2292_p4 = scmp.lt.u32.totalorder %s2290_s6, %s2285_s22 }
  0x8a   : > { %p2294_p1 = scmp.lt.u32.totalorder %s2285_s22, %s512_s12 }
  0x8b   : > { %p2288_p8 = pnand %p2286_p7, %p2756_p13  ;;  %p2293_p5 = por %p2292_p4, %p2291_p3 }
  0x8d   : > { %p2289_p0 = pneg %p2288_p8  ;;  %p2295_p10 = por %p2294_p1, %p2293_p5 }
  0x8f   : > { %p2296_p6 = pnand %p2295_p10, %p2289_p0 }
  0x91   : > { %2299 = shalt.err (!%p2296_p6)
}
  0x92   : > { %s2300_s10 = scalar_lea.vmem %s515_s24, 32  ;;  %s2508_s20 = smov [#allocation10]  }
  0x93   : > { %p2301_p11 = scmp.ne.s32.totalorder %s515_s24, %s2300_s10  ;;  %s2305_s23 = sshll.u32 %s2508_s20, 4  ;;  %s2306_s23 = int_to_ptr.vmem [resolvable:$false] %s2305_s23 }
  0x94   : > { %s2307_s4 = scalar_lea.vmem %s2306_s23, 64  ;;  %p2308_p7 = scmp.lt.s32.totalorder %s515_s24, %s2306_s23 }
  0x95   : > { %p2303_p2 = pnand %p2301_p11, %p2756_p13  ;;  %p2309_p8 = scmp.lt.s32.totalorder %s2307_s4, %s2300_s10 }
  0x97   : > { %p2304_p9 = pneg %p2303_p2  ;;  %p2310_p12 = por %p2309_p8, %p2308_p7 }
  0x99   : > { %p2311_p3 = pnand %p2310_p12, %p2304_p9 }
  0x9b   : > { %2314 = shalt.err (!%p2311_p3)
}
  0x9c   : > { %p3264_p4 = scmp.ne.s32.totalorder %s3256_s3, 0  ;;  %s2822_s6 = sadd.s32 4294967295, %s2503_s18  }
  0x9d   : > { %s1828_s27 = sadd.s32 4294967294, %s2503_s18   ;;  %p62_p12 = scmp.ne.s32.totalorder %s2479_s29, %s2475_s28 }
  0x9e   : > { %2042 = dma.hbm_to_vmem [thread:$0]  (!%p3264_p4), %s512_s12, 32, %s515_s24, %s2714_s8  }
  0x9f   : > { %p3217_p0 = scmp.eq.s32.totalorder %s2822_s6, 0  ;;  %p161_p5 = scmp.ne.s32.totalorder %s2467_s26, %s2463_s25 }
  0xa0   : > { %p388_p1 = scmp.eq.s32.totalorder %s2822_s6, 3  ;;  %p394_p6 = scmp.eq.s32.totalorder %s1828_s27, 3 }
  0xa1   : > { %p2833_p10 = por %p3217_p0, %p62_p12  ;;  %p2839_p11 = por %p161_p5, %p3217_p0 }
  0xa2   : > { %p3267_p2 = scmp.ne.s32.totalorder %s2483_s30, %s2479_s29  ;;  %p2850_p7 = por %p394_p6, %p62_p12 }
  0xa3   : > { %s3265_s19 = scalar_select %p2833_p10, 1, 0 }
  0xa4   : > { %s3266_s24 = scalar_select %p2839_p11, 1, 0 }
  0xa5   : > { %p2846_p9 = por %p388_p1, %p3267_p2  ;;  %p1829_p8 = scmp.ge.s32.totalorder %s2503_s18, 1 }
  0xa6   : > { %s3269_s25 = scalar_select %p2850_p7, 1, 0 }
  0xa7   : > { %s3268_s15 = scalar_select %p2846_p9, 1, 0 }
  0xa8   : > { %3270 = sst [smem:[#allocation28_spill]] %s3269_s25  ;;  %p401_p3 = scmp.lt.s32.totalorder %s2503_s18, 5 }
  0xa9   : > { %s2509_s12 = smov [#allocation6]   ;;  %s3272_s9 = sld [smem:[#allocation38_spill]] }
  0xaa   : > { %p2856_p10 = pnand %p1829_p8, %p401_p3  ;;  %s414_s22 = sshll.u32 %s2509_s12, 4  ;;  %s2871_s22 = int_to_ptr.vmem [resolvable:$true] %s414_s22 }
  0xab   : > { %s532_s20 = scalar_lea.vmem [#allocation11], %s2712_s5 }
  0xac   : > { %s3271_s0 = scalar_select %p2856_p10, 1, 0 }
  0xad   : > { %p2026_p12 = pneg %p2856_p10  ;;  %s539_s23 = sshll.u32 %s532_s20, 4  ;;  %s2869_s23 = int_to_ptr.vmem [resolvable:$true] %s539_s23 }
  0xaf   : > { %s2864_s10 = scalar_lea.hbm %s3272_s9, %s2743_s11  ;;  %p2875_p5 = pnand %p2026_p12, %p3217_p0 }
  0xb0   : > { %s2315_s27 = scalar_lea.hbm %s2864_s10, 16  ;;  %s2320_s21 = scalar_lea.hbm %s3272_s9, 32 }
  0xb1   : > { %s3273_s4 = scalar_select %p2875_p5, 1, 0 }
  0xb2   : > { %p2316_p1 = scmp.ne.s32.totalorder %s2864_s10, %s2315_s27  ;;  %p2321_p8 = scmp.lt.u32.totalorder %s2864_s10, %s3272_s9 }
  0xb3   : > { %p2322_p3 = scmp.lt.u32.totalorder %s2320_s21, %s2315_s27  ;;  %p2324_p9 = scmp.lt.u32.totalorder %s2315_s27, %s2864_s10 }
  0xb4   : > { %p2318_p6 = pnand %p2316_p1, %p2756_p13 }
  0xb5   : > { %p2323_p7 = por %p2322_p3, %p2321_p8 }
  0xb6   : > { %p2319_p2 = pneg %p2318_p6 }
  0xb7   : > { %p2325_p12 = por %p2324_p9, %p2323_p7 }
  0xb9   : > { %p2326_p0 = pnand %p2325_p12, %p2319_p2 }
  0xbb   : > { %2329 = shalt.err (!%p2326_p0)
}
  0xbc   : > { %s2330_s20 = scalar_lea.vmem %s2869_s23, 16  ;;  %s2510_s11 = smov [#allocation11]  }
  0xbd   : > { %p2331_p1 = scmp.ne.s32.totalorder %s2869_s23, %s2330_s20  ;;  %s2335_s12 = sshll.u32 %s2510_s11, 4  ;;  %s2336_s12 = int_to_ptr.vmem [resolvable:$false] %s2335_s12 }
  0xbe   : > { %s2337_s5 = scalar_lea.vmem %s2336_s12, 32  ;;  %p2338_p10 = scmp.lt.s32.totalorder %s2869_s23, %s2336_s12 }
  0xbf   : > { %p2333_p6 = pnand %p2331_p1, %p2756_p13  ;;  %p2339_p5 = scmp.lt.s32.totalorder %s2337_s5, %s2330_s20 }
  0xc1   : > { %p2334_p11 = pneg %p2333_p6  ;;  %p2340_p8 = por %p2339_p5, %p2338_p10 }
  0xc3   : > { %p2341_p3 = pnand %p2340_p8, %p2334_p11 }
  0xc5   : > { %2344 = shalt.err (!%p2341_p3)
}
  0xc6   : > { %2045 = dma.hbm_to_vmem [thread:$0]  (!%p3264_p4), %s2864_s10, 16, %s2869_s23, %s2714_s8  }
  0xc7   : > { %s3274_s1 = sld [smem:[#allocation30_spill]]  ;;  %p3275_p0 = scmp.ne.s32.totalorder %s3273_s4, 0 }
  0xc9   : > { %p2347_p9 = pneg %p3275_p0 }
  0xcd   : > { %s2345_s21 = scalar_lea.hbm %s3274_s1, 128 }
  0xce   : > { %p2346_p13 = scmp.ne.s32.totalorder %s3274_s1, %s2345_s21  ;;  %p2352_p7 = scmp.lt.u32.totalorder %s2345_s21, %s3274_s1 }
  0xd0   : > { %p2348_p10 = pnand %p2347_p9, %p2346_p13 }
  0xd2   : > { %p2349_p11 = pneg %p2348_p10 }
  0xd4   : > { %p2354_p5 = pnand %p2352_p7, %p2349_p11 }
  0xd6   : > { %2357 = shalt.err (!%p2354_p5)
}
  0xd7   : > { %s2358_s3 = scalar_lea.vmem %s2871_s22, 128  ;;  %p2366_p1 = scmp.lt.s32.totalorder %s2871_s22, %s2871_s22 }
  0xd8   : > { %p2359_p4 = scmp.ne.s32.totalorder %s2871_s22, %s2358_s3  ;;  %p2367_p6 = scmp.lt.s32.totalorder %s2358_s3, %s2358_s3 }
  0xda   : > { %p2361_p2 = pnand %p2359_p4, %p2347_p9  ;;  %p2368_p8 = por %p2367_p6, %p2366_p1 }
  0xdc   : > { %p2362_p12 = pneg %p2361_p2 }
  0xde   : > { %p2369_p3 = pnand %p2368_p8, %p2362_p12 }
  0xe0   : > { %2372 = shalt.err (!%p2369_p3)
}
  0xe1   : > { %2029 = dma.hbm_to_vmem [thread:$0]  (!%p3275_p0), %s3274_s1, 128, %s2871_s22, [#allocation7]  }
  0xe2   : > { %p3276_p13 = scmp.ne.s32.totalorder %s3271_s0, 0 }
  0xe3   : > { %s564_s23 = sand.u32 (!%p3276_p13), 1, %s2822_s6   ;;  %s3221_s5 = sand.u32 (!%p3276_p13), 1, %s2479_s29  }
  0xe4   : > { %562 = sbr.rel (%p3276_p13) target bundleno = 3184 (0xc70), region = 72  ;;  %s2928_s27 = sshll.u32 (!%p3276_p13), %s3221_s5, 3 }
  0xe5   : > { %s565_s13 = scalar_lea.sflag (!%p3276_p13), [#allocation4], %s564_s23  ;;  %s568_s4 = scalar_lea.vmem (!%p3276_p13), [#allocation3], %s2928_s27 }
  0xe6   : > { %p3277_p9 = scmp.ne.s32.totalorder (!%p3276_p13), %s3265_s19, 0 }
  0xeb   : > { %2446 = dma.done.wait (%p3277_p9), %s565_s13, 128  }
  0xec   : > { %2448 = vsyncadd (%p3277_p9), %s565_s13, 4294967168  ;;  %p3278_p0 = scmp.eq.s32.totalorder %s2822_s6, 0 }
  0xee   : > { %2450 = dma.done.wait (%p3278_p0), [#allocation7], 128   ;;  %p3279_p10 = pmov %p3278_p0 }
  0xef   : > { %s2940_s0 = sand.u32 1, %s2467_s26   ;;  %p3280_p11 = scmp.ne.s32.totalorder %s3266_s24, 0 }
  0xf0   : > { %2452 = vsyncadd (%p3279_p10), [#allocation7], 4294967168 }
  0xf1   : > { %2454 = dma.done.wait (%p3280_p11), %s565_s13, 80  }
  0xf2   : > { %2456 = vsyncadd (%p3280_p11), %s565_s13, 4294967216  ;;  %s1842_s19 = sshll.u32 %s2940_s0, 1  ;;  %p692_p7 = scmp.lt.s32.totalorder %s2487_s14, 1 }
  0xf3   : > { %s3281_s2 = sld [smem:[#allocation31_spill]]  ;;  %s3282_s8 = sld [smem:[#allocation32_spill]] }
  0xf4   : > { %s2950_s6 = scalar_select %p692_p7, %s2487_s14, 1 }
  0xf5   : > { %s3283_s5 = sld [smem:[#allocation34_spill]]  ;;  %s3284_s9 = sld [smem:[#allocation37_spill]] }
  0xf6   : > { %s1844_s21 = sshll.u32 %s2950_s6, 1  ;;  %s1889_s17 = sshll.u32 %s2950_s6, 4 }
  0xf7   : > { %s1892_s30 = sshll.u32 %s2950_s6, 5  ;;  %s3286_s12 = sld [smem:[#allocation39_spill]] }
  0xf8   : > { %s2985_s28 = scalar_lea.vmem [#allocation10], %s1842_s19  ;;  %s2989_s23 = scalar_lea.vmem [#allocation12], %s2928_s27 }
  0xf9   : > { %s2957_s24 = scalar_lea.vmem %s3281_s2, %s1844_s21  ;;  %s2962_s10 = scalar_lea.vmem %s3282_s8, %s1889_s17 }
  0xfa   : > { %s3285_s21 = sld [smem:[#allocation40_spill]]  ;;  %s588_s8 = scalar_lea.vmem [#allocation9], %s2940_s0 }
  0xfb   : > { %s2967_s22 = scalar_lea.vmem %s3283_s5, %s1889_s17  ;;  %s2972_s16 = scalar_lea.vmem %s3284_s9, %s1889_s17 }
  0xfc   : > { %s605_s5 = scalar_lea.vmem [#allocation11], %s2940_s0  ;;  %p1853_p5 = scmp.ne.s32.totalorder %s2487_s14, 0 }
  0xfd   : > { %s2982_s3 = scalar_lea.vmem %s3286_s12, %s1892_s30  ;;  %v726_v0 = vld [vmem:[%s568_s4] sm:$0xff] (!%p1853_p5)  ;;  %vm727_vm0 = vcmask (!%p1853_p5), 261120  }
  0xfe   : > { %725 = sbr.rel (%p1853_p5) target bundleno = 261 (0x105), region = 100  ;;  %728 = vst.msk [vmem:[%s2989_s23] sm:$0xff] (!%p1853_p5), %vm727_vm0, %v726_v0 }
 0x100   : > { %s718_s20 = scalar_lea.vmem %s3285_s21, %s2950_s6 }
 0x105 PF: > { %v2994_v1 = vld [vmem:[%s2989_s23] sm:$0xff]  ;;  %vm731_vm1 = vcmask 261120   ;;  %v2511_v9 = vmov 0.0   ;;  %vm2512_vm2 = vmmov 0   ;;  %v746_v13 = vlaneseq  ;;  %v730_v17 = vld [vmem:[%s2957_s24] sm:$0x3] }
 0x106   : > { %v732_v2 = vsel %vm731_vm1, %v2994_v1, 0.0  ;;  %v2159_v8 = vld [vmem:[%s2962_s10] sm:$0xff]   ;;  %1926 = vmatprep.subr.bf16.mxu0 %v2511_v9  ;;  %1930 = vmatprep.mubr.msk.bf16.mxu0 %vm2512_vm2, %v2511_v9  ;;  %v2160_v10 = vld [vmem:[%s2962_s10 + $0x8] sm:$0xff]   ;;  %s3287_s1 = scalar_lea.vmem [#allocation8], %s2940_s0  ;;  %s2513_s2 = smov 120   ;;  %vm828_vm3 = vcmask 64512  }
 0x107   : > { %733 = vadd.xlane.f32.xlu0 %v732_v2  ;;  %1927 = vmatpush3.bf16.msra.mxu0 %v2159_v8  ;;  %v747_v15 = vshrl.u32 %v746_v13, 7  ;;  %v1854_v26 = vld [vmem:[%s3287_s1] ss:$0 sm:$0xff]  ;;  %s2514_s7 = smov 96   ;;  %s2515_s9 = smov 88   ;;  %v823_v44 = vld [vmem:[#allocation6] sm:$0xff] }
 0x108   : > { %1934 = vmatprep.subr.bf16.mxu1 %v2511_v9  ;;  %1928 = vmatprep.subr.bf16.mxu0 %v2511_v9  ;;  %s2516_s26 = smov 80   ;;  %s2517_s30 = smov 112   ;;  %vm892_vm4 = vcmask 1043456   ;;  %vm937_vm5 = vcmask 60416   ;;  %vm1056_vm6 = vcmask 126016   ;;  %vm1175_vm7 = vcmask 191616  }
 0x109   : > { %1936 = vmatprep.mubr.msk.bf16.mxu1 %vm2512_vm2, %v2511_v9  ;;  %v3010_v16 = vsub.s32 0, %v747_v15  ;;  %v3013_v18 = vsub.s32 1, %v747_v15  ;;  %s2518_s25 = smov 72   ;;  %s2519_s27 = smov 104   ;;  %vm1294_vm8 = vcmask 257216   ;;  %vm1503_vm9 = vcmask 523264  }
 0x10a   : > { %s2520_s4 = smov 64   ;;  %s2521_s19 = smov 56  }
 0x10b   : > { %1929 = vmatpush3.bf16.msra.mxu0 %v2160_v10  ;;  %v749_v19 = vrot.slane %v730_v17, %v3010_v16  ;;  %v754_v22 = vrot.slane %v730_v17, %v3013_v18  ;;  %s2522_s17 = smov 48   ;;  %s2523_s24 = smov 40  }
 0x10c   : > { %1940 = vmatprep.subr.bf16.mxu0 %v2511_v9  ;;  %s2524_s10 = smov 8   ;;  %s2525_s13 = smov 16  }
 0x10d   : > { %s2526_s11 = smov 24   ;;  %p1883_p4 = scmp.ge.s32.totalorder %s2487_s14, 1 }
 0x194   : > { %v734_v3 = vpop.xlane.xlu0 %733 }
 0x195   : > { %v736_v4 = vmul.f32 0.03125, %v734_v3 }
 0x197   : > { %v737_v5 = vsub.f32 %v2994_v1, %v736_v4 }
 0x199   : > { %v738_v6 = vmul.f32 %v737_v5, %v737_v5 }
 0x19b   : > { %v739_v7 = vsel %vm731_vm1, %v738_v6, 0.0 }
 0x19c   : > { %740 = vadd.xlane.f32.xlu0 %v739_v7 }
 0x229   : > { %v741_v11 = vpop.xlane.xlu0 %740 }
 0x22a   : > { %v742_v12 = vmul.f32 0.03125, %v741_v11 }
 0x22c   : > { %v743_v14 = vadd.f32 1e-05, %v742_v12 }
 0x22e   : > { %2169 = vrsqrt.f32 %v743_v14 }
 0x238   : > { %v2170_v20 = vpop.eup %2169 }
 0x239   : > { %v745_v21 = vmul.f32 %v2170_v20, %v737_v5 }
 0x23b   : > { %v750_v23 = vmul.f32 %v749_v19, %v745_v21 }
 0x23d   : > { %v755_v24 = vadd.f32 %v754_v22, %v750_v23 }
 0x23f   : > { %v756_v25 = vpack.c.bf16 %v755_v24, %v755_v24 }
 0x241   : > { %1931 = vmatmul.mubr.msk.bf16.vlgmr.msra.gmra.mrb[0].mxu0 %vm731_vm1, %v756_v25 }
 0x242   : > { %1942 = vmatprep.mubr.msk.bf16.mxu0 %vm2512_vm2, %v2511_v9 }
 0x314   : > { %v817_v27 = vpop.f32.mrb[0].mxu0 }
 0x315   : > { %v818_v28 = vadd.f32 %v1854_v26, %v817_v27  ;;  %v1932_v29 = vpop.f32.mrb[1].mxu0 }
 0x316   : > { %v820_v30 = vpop.f32.mrb[2].mxu0 }
 0x317   : > { %v3022_v31 = vpack.c.bf16 %v818_v28, %v818_v28  ;;  %v1933_v32 = vpop.f32.mrb[3].mxu0 }
 0x319   : > { %939 = vrot.lane.b32.xlu0 %v3022_v31, %s2513_s2  ;;  %826 = vrot.lane.b32.xlu1 %v3022_v31, %s2514_s7 }
 0x31d   : > { %941 = vrot.lane.b32.xlu1 %v3022_v31, %s2515_s9 }
 0x321   : > { %1060 = vrot.lane.b32.xlu1 %v3022_v31, %s2516_s26 }
 0x325   : > { %1058 = vrot.lane.b32.xlu1 %v3022_v31, %s2517_s30 }
 0x329   : > { %1179 = vrot.lane.b32.xlu1 %v3022_v31, %s2518_s25 }
 0x32d   : > { %1177 = vrot.lane.b32.xlu1 %v3022_v31, %s2519_s27 }
 0x38b   : > { %v827_v33 = vpop.permute.xlu1 %826  ;;  %v940_v38 = vpop.permute.xlu0 %939 }
 0x38c   : > { %v833_v34 = vsel %vm828_vm3, %v827_v33, 0 }
 0x38d   : > { %1935 = vmatpush3.bf16.xpose.msra.mxu1 %v833_v34 }
 0x38e   : > { %1946 = vmatprep.subr.bf16.mxu1 %v2511_v9 }
 0x38f   : > { %v942_v35 = vpop.permute.xlu1 %941 }
 0x390   : > { %v947_v36 = vsel %vm828_vm3, %v942_v35, 0 }
 0x393   : > { %v1061_v37 = vpop.permute.xlu1 %1060 }
 0x394   : > { %1937 = vmatmul.mubr.msk.bf16.vlgmr.msra.gmra.mrb[0].mxu1 %vm828_vm3, %v3022_v31  ;;  %v1066_v40 = vsel %vm828_vm3, %v1061_v37, 0 }
 0x395   : > { %1947 = vmatpush3.bf16.xpose.msra.mxu1 %v947_v36  ;;  %1948 = vmatprep.mubr.msk.bf16.mxu1 %vm2512_vm2, %v2511_v9 }
 0x396   : > { %1958 = vmatprep.subr.bf16.mxu1 %v2511_v9 }
 0x397   : > { %v1059_v39 = vpop.permute.xlu1 %1058 }
 0x39b   : > { %v1180_v41 = vpop.permute.xlu1 %1179 }
 0x39c   : > { %1949 = vmatmul.mubr.msk.bf16.vlgmr.msra.gmra.mrb[4].mxu1 %vm828_vm3, %v940_v38  ;;  %v1185_v42 = vsel %vm828_vm3, %v1180_v41, 0 }
 0x39d   : > { %1959 = vmatpush3.bf16.xpose.msra.mxu1 %v1066_v40  ;;  %1960 = vmatprep.mubr.msk.bf16.mxu1 %vm2512_vm2, %v2511_v9 }
 0x39e   : > { %1970 = vmatprep.subr.bf16.mxu1 %v2511_v9 }
 0x39f   : > { %v1178_v43 = vpop.permute.xlu1 %1177 }
 0x3a4   : > { %1961 = vmatmul.mubr.msk.bf16.vlgmr.msra.gmra.mrb[8].mxu1 %vm828_vm3, %v1059_v39 }
 0x3a5   : > { %1971 = vmatpush3.bf16.xpose.msra.mxu1 %v1185_v42  ;;  %1972 = vmatprep.mubr.msk.bf16.mxu1 %vm2512_vm2, %v2511_v9 }
 0x3a6   : > { %1982 = vmatprep.subr.bf16.mxu1 %v2511_v9 }
 0x3ac   : > { %1973 = vmatmul.mubr.msk.bf16.vlgmr.msra.gmra.mrb[12].mxu1 %vm828_vm3, %v1178_v43 }
 0x3ad   : > { %1986 = vmatprep.mubr.msk.bf16.mxu1 %vm2512_vm2, %v2511_v9 }
 0x467   : > { %v869_v45 = vpop.f32.mrb[0].mxu1 }
 0x468   : > { %v870_v46 = vadd.f32 %v869_v45, %v823_v44  ;;  %v1938_v47 = vpop.f32.mrb[1].mxu1 }
 0x469   : > { %v872_v48 = vpop.f32.mrb[2].mxu1 }
 0x46a   : > { %v1939_v49 = vpop.f32.mrb[3].mxu1  ;;  %v875_v50 = vsel %vm828_vm3, %v870_v46, -inf }
 0x46b   : > { %876 = vmax.xlane.f32.xlu1 %v875_v50 }
 0x46f   : > { %v983_v51 = vpop.f32.mrb[4].mxu1 }
 0x470   : > { %v984_v52 = vadd.f32 %v983_v51, %v823_v44  ;;  %v1950_v53 = vpop.f32.mrb[5].mxu1 }
 0x471   : > { %v986_v54 = vpop.f32.mrb[6].mxu1 }
 0x472   : > { %v1951_v55 = vpop.f32.mrb[7].mxu1  ;;  %v989_v56 = vsel %vm828_vm3, %v984_v52, -inf }
 0x473   : > { %990 = vmax.xlane.f32.xlu0 %v989_v56 }
 0x477   : > { %v1102_v57 = vpop.f32.mrb[8].mxu1 }
 0x478   : > { %v1103_v58 = vadd.f32 %v1102_v57, %v823_v44  ;;  %v1962_v59 = vpop.f32.mrb[9].mxu1 }
 0x479   : > { %v1105_v60 = vpop.f32.mrb[10].mxu1 }
 0x47a   : > { %v1963_v61 = vpop.f32.mrb[11].mxu1  ;;  %v1108_v62 = vsel %vm828_vm3, %v1103_v58, -inf }
 0x47b   : > { %1109 = vmax.xlane.f32.xlu1 %v1108_v62 }
 0x47f   : > { %v1221_v63 = vpop.f32.mrb[12].mxu1 }
 0x480   : > { %v1222_v0 = vadd.f32 %v1221_v63, %v823_v44  ;;  %v1974_v2 = vpop.f32.mrb[13].mxu1  ;;  %v2161_v63 = vld [vmem:[%s2967_s22] sm:$0xff]  }
 0x481   : > { %v1224_v3 = vpop.f32.mrb[14].mxu1  ;;  %1983 = vmatpush3.bf16.msra.mxu1 %v2161_v63  ;;  %v2162_v2 = vld [vmem:[%s2967_s22 + $0x8] sm:$0xff]  }
 0x482   : > { %v1975_v4 = vpop.f32.mrb[15].mxu1  ;;  %v1227_v5 = vsel %vm828_vm3, %v1222_v0, -inf  ;;  %1984 = vmatprep.subr.bf16.mxu1 %v2511_v9 }
 0x483   : > { %1228 = vmax.xlane.f32.xlu0 %v1227_v5 }
 0x485   : > { %1985 = vmatpush3.bf16.msra.mxu1 %v2162_v2 }
 0x486   : > { %1998 = vmatprep.subr.bf16.mxu1 %v2511_v9 }
 0x4f8   : > { %v877_v6 = vpop.xlane.xlu1 %876 }
 0x4f9   : > { %v878_v7 = vsub.f32 %v870_v46, %v877_v6 }
 0x4fb   : > { %v879_v8 = vmul.f32 1.442695, %v878_v7 }
 0x4fd   : > { %2171 = vpow2.f32 %v879_v8 }
 0x500   : > { %v991_v10 = vpop.xlane.xlu0 %990 }
 0x501   : > { %v992_v11 = vsub.f32 %v984_v52, %v991_v10 }
 0x503   : > { %v993_v12 = vmul.f32 1.442695, %v992_v11 }
 0x505   : > { %2173 = vpow2.f32 %v993_v12 }
 0x507   : > { %v2172_v13 = vpop.eup %2171 }
 0x508   : > { %v881_v14 = vsel %vm828_vm3, %v2172_v13, 0.0  ;;  %v1110_v24 = vpop.xlane.xlu1 %1109 }
 0x509   : > { %882 = vadd.xlane.f32.xlu1 %v881_v14  ;;  %v1111_v25 = vsub.f32 %v1103_v58, %v1110_v24 }
 0x50b   : > { %v1112_v26 = vmul.f32 1.442695, %v1111_v25 }
 0x50f   : > { %v2174_v15 = vpop.eup %2173 }
 0x510   : > { %v1229_v17 = vpop.xlane.xlu0 %1228  ;;  %v995_v19 = vsel %vm828_vm3, %v2174_v15, 0.0 }
 0x511   : > { %v1230_v20 = vsub.f32 %v1222_v0, %v1229_v17  ;;  %996 = vadd.xlane.f32.xlu0 %v995_v19  ;;  %v1869_v19 = vld [vmem:[%s588_s8] ss:$0 sm:$0xff] }
 0x513   : > { %v1231_v21 = vmul.f32 1.442695, %v1230_v20 }
 0x515   : > { %2175 = vpow2.f32 %v1231_v21 }
 0x516   : > { %2177 = vpow2.f32 %v1112_v26 }
 0x51a   : > { %887 = vrot.lane.b32.xlu1 %v3022_v31, %s2520_s4 }
 0x51f   : > { %v2176_v22 = vpop.eup %2175 }
 0x520   : > { %v1233_v23 = vsel %vm828_vm3, %v2176_v22, 0.0  ;;  %v2178_v27 = vpop.eup %2177 }
 0x521   : > { %1234 = vadd.xlane.f32.xlu0 %v1233_v23  ;;  %v1114_v28 = vsel %vm828_vm3, %v2178_v27, 0.0 }
 0x537   : > { %1001 = vrot.lane.b32.xlu0 %v3022_v31, %s2521_s19 }
 0x53e   : > { %1115 = vadd.xlane.f32.xlu1 %v1114_v28 }
 0x54f   : > { %1120 = vrot.lane.b32.xlu1 %v3022_v31, %s2522_s17 }
 0x553   : > { %1239 = vrot.lane.b32.xlu1 %v3022_v31, %s2523_s24 }
 0x596   : > { %v883_v29 = vpop.xlane.xlu1 %882 }
 0x597   : > { %2179 = vrcp.f32 %v883_v29 }
 0x59a   : > { %v888_v30 = vpop.permute.xlu1 %887 }
 0x59b   : > { %v894_v32 = vsel %vm892_vm4, %v888_v30, 0 }
 0x59c   : > { %1941 = vmatpush3.bf16.msra.mxu0 %v894_v32 }
 0x59d   : > { %1952 = vmatprep.subr.bf16.mxu0 %v2511_v9 }
 0x59e   : > { %v997_v34 = vpop.xlane.xlu0 %996 }
 0x59f   : > { %2181 = vrcp.f32 %v997_v34  ;;  %v2164_v34 = vld [vmem:[%s2972_s16 + $0x8] sm:$0xff]  }
 0x5a1   : > { %v2180_v33 = vpop.eup %2179 }
 0x5a2   : > { %v885_v35 = vmul.f32 %v2180_v33, %v2172_v13  ;;  %v2163_v33 = vld [vmem:[%s2972_s16] sm:$0xff]  }
 0x5a4   : > { %v886_v36 = vpack.c.bf16 %v885_v35, %v885_v35 }
 0x5a6   : > { %1943 = vmatmul.mubr.msk.bf16.vlgmr.msra.gmra.mrb[4].mxu0 %vm828_vm3, %v886_v36 }
 0x5a7   : > { %1954 = vmatprep.mubr.msk.bf16.mxu0 %vm2512_vm2, %v2511_v9 }
 0x5a9   : > { %v2182_v31 = vpop.eup %2181 }
 0x5aa   : > { %v999_v38 = vmul.f32 %v2182_v31, %v2174_v15  ;;  %v1364_v31 = vld [vmem:[%s2985_s28] sm:$0x3] }
 0x5ac   : > { %v1000_v41 = vpack.c.bf16 %v999_v38, %v999_v38 }
 0x5ae   : > { %v1235_v37 = vpop.xlane.xlu0 %1234 }
 0x5b2   : > { %v1002_v39 = vpop.permute.xlu0 %1001 }
 0x5b3   : > { %v1007_v40 = vsel %vm892_vm4, %v1002_v39, 0  ;;  %v1386_v39 = vrot.slane %v1364_v31, %v3013_v18 }
 0x5b4   : > { %1953 = vmatpush3.bf16.msra.mxu0 %v1007_v40 }
 0x5b5   : > { %1964 = vmatprep.subr.bf16.mxu0 %v2511_v9 }
 0x5b7   : > { %1955 = vmatmul.mubr.msk.bf16.vlgmr.msra.gmra.mrb[8].mxu0 %vm828_vm3, %v1000_v41 }
 0x5b8   : > { %1966 = vmatprep.mubr.msk.bf16.mxu0 %vm2512_vm2, %v2511_v9 }
 0x5cb   : > { %v1116_v42 = vpop.xlane.xlu1 %1115 }
 0x5cc   : > { %2183 = vrcp.f32 %v1116_v42 }
 0x5cd   : > { %2185 = vrcp.f32 %v1235_v37  ;;  %v1381_v37 = vrot.slane %v1364_v31, %v3010_v16 }
 0x5cf   : > { %v1121_v43 = vpop.permute.xlu1 %1120 }
 0x5d0   : > { %v1126_v44 = vsel %vm892_vm4, %v1121_v43, 0 }
 0x5d1   : > { %1965 = vmatpush3.bf16.msra.mxu0 %v1126_v44  ;;  %v2165_v44 = vld [vmem:[%s2982_s3] sm:$0xff]  }
 0x5d2   : > { %1976 = vmatprep.subr.bf16.mxu0 %v2511_v9 }
 0x5d3   : > { %v1240_v47 = vpop.permute.xlu1 %1239 }
 0x5d4   : > { %v1245_v50 = vsel %vm892_vm4, %v1240_v47, 0  ;;  %v2168_v47 = vld [vmem:[%s2982_s3 + $0x18] sm:$0xff]  }
 0x5d6   : > { %v2184_v45 = vpop.eup %2183 }
 0x5d7   : > { %v1118_v46 = vmul.f32 %v2184_v45, %v2178_v27  ;;  %v2186_v49 = vpop.eup %2185  ;;  %v2166_v45 = vld [vmem:[%s2982_s3 + $0x8] sm:$0xff]  }
 0x5d8   : > { %v1237_v51 = vmul.f32 %v2186_v49, %v2176_v22 }
 0x5d9   : > { %v1119_v48 = vpack.c.bf16 %v1118_v46, %v1118_v46  ;;  %v2167_v46 = vld [vmem:[%s2982_s3 + $0x10] sm:$0xff]  }
 0x5da   : > { %v1238_v52 = vpack.c.bf16 %v1237_v51, %v1237_v51 }
 0x5db   : > { %1967 = vmatmul.mubr.msk.bf16.vlgmr.msra.gmra.mrb[12].mxu0 %vm828_vm3, %v1119_v48  ;;  %v1873_v48 = vld [vmem:[%s605_s5] ss:$0 sm:$0xff] }
 0x5dc   : > { %1977 = vmatpush3.bf16.msra.mxu0 %v1245_v50  ;;  %1978 = vmatprep.mubr.msk.bf16.mxu0 %vm2512_vm2, %v2511_v9 }
 0x5dd   : > { %1990 = vmatprep.subr.bf16.mxu0 %v2511_v9 }
 0x5e3   : > { %1979 = vmatmul.mubr.msk.bf16.vlgmr.msra.gmra.mrb[16].mxu0 %vm828_vm3, %v1238_v52 }
 0x5e4   : > { %1994 = vmatprep.mubr.msk.bf16.mxu0 %vm2512_vm2, %v2511_v9  ;;  %1991 = vmatpush3.bf16.msra.mxu0 %v2163_v33 }
 0x5e5   : > { %1992 = vmatprep.subr.bf16.mxu0 %v2511_v9 }
 0x5e8   : > { %1993 = vmatpush3.bf16.msra.mxu0 %v2164_v34 }
 0x679   : > { %v930_v53 = vpop.f32.mrb[4].mxu0 }
 0x67a   : > { %v936_v54 = vpack.c.bf16 %v930_v53, %v930_v53  ;;  %v1944_v55 = vpop.f32.mrb[5].mxu0 }
 0x67b   : > { %v933_v56 = vpop.f32.mrb[6].mxu0 }
 0x67c   : > { %938 = vst.msk [vmem:[#allocation2] sm:$0xf] %vm937_vm5, %v936_v54  ;;  %v1945_v57 = vpop.f32.mrb[7].mxu0 }
 0x68a   : > { %v1043_v58 = vpop.f32.mrb[8].mxu0 }
 0x68b   : > { %v1893_v59 = vpack.c.bf16 %v1043_v58, %v1043_v58  ;;  %v1956_v60 = vpop.f32.mrb[9].mxu0 }
 0x68c   : > { %v1046_v61 = vpop.f32.mrb[10].mxu0 }
 0x68d   : > { %1053 = vrot.lane.b32.xlu0 %v1893_v59, %s2524_s10  ;;  %v1957_v62 = vpop.f32.mrb[11].mxu0  ;;  %v1877_v61 = vld [vmem:[%s718_s20] ss:$0 sm:$0xff] }
 0x6ae   : > { %v1162_v0 = vpop.f32.mrb[12].mxu0 }
 0x6af   : > { %v1894_v3 = vpack.c.bf16 %v1162_v0, %v1162_v0  ;;  %v1968_v4 = vpop.f32.mrb[13].mxu0 }
 0x6b0   : > { %v1165_v5 = vpop.f32.mrb[14].mxu0 }
 0x6b1   : > { %1172 = vrot.lane.b32.xlu1 %v1894_v3, %s2525_s13  ;;  %v1969_v6 = vpop.f32.mrb[15].mxu0 }
 0x6b6   : > { %v1281_v7 = vpop.f32.mrb[16].mxu0 }
 0x6b7   : > { %v1895_v8 = vpack.c.bf16 %v1281_v7, %v1281_v7  ;;  %v1980_v10 = vpop.f32.mrb[17].mxu0 }
 0x6b8   : > { %v1284_v11 = vpop.f32.mrb[18].mxu0 }
 0x6b9   : > { %1291 = vrot.lane.b32.xlu0 %v1895_v8, %s2526_s11  ;;  %v1981_v12 = vpop.f32.mrb[19].mxu0 }
 0x6ff   : > { %v1054_v13 = vpop.permute.xlu0 %1053 }
 0x700   : > { %1057 = vst.msk [vmem:[#allocation2] sm:$0xf] %vm1056_vm6, %v1054_v13 }
 0x723   : > { %v1173_v14 = vpop.permute.xlu1 %1172 }
 0x724   : > { %1176 = vst.msk [vmem:[#allocation2] sm:$0xf] %vm1175_vm7, %v1173_v14 }
 0x72b   : > { %v1292_v15 = vpop.permute.xlu0 %1291 }
 0x72c   : > { %1295 = vst.msk [vmem:[#allocation2] sm:$0xf] %vm1294_vm8, %v1292_v15 }
 0x733   : > { %v1296_v17 = vld [vmem:[#allocation2] sm:$0xf] }
 0x734   : > { %1987 = vmatmul.mubr.msk.bf16.vlgmr.msra.gmra.mrb[16].mxu1 %vm731_vm1, %v1296_v17 }
 0x735   : > { %2006 = vmatprep.mubr.msk.bf16.mxu1 %vm2512_vm2, %v2511_v9  ;;  %1999 = vmatpush3.bf16.msra.mxu1 %v2165_v44 }
 0x736   : > { %2000 = vmatprep.subr.bf16.mxu1 %v2511_v9 }
 0x739   : > { %2001 = vmatpush3.bf16.msra.mxu1 %v2166_v45 }
 0x73a   : > { %2002 = vmatprep.subr.bf16.mxu1 %v2511_v9 }
 0x73d   : > { %2003 = vmatpush3.bf16.msra.mxu1 %v2167_v46 }
 0x73e   : > { %2004 = vmatprep.subr.bf16.mxu1 %v2511_v9 }
 0x741   : > { %2005 = vmatpush3.bf16.msra.mxu1 %v2168_v47 }
 0x807   : > { %v1357_v20 = vpop.f32.mrb[16].mxu1 }
 0x808   : > { %v1358_v21 = vadd.f32 %v1869_v19, %v1357_v20  ;;  %v1988_v22 = vpop.f32.mrb[17].mxu1 }
 0x809   : > { %v1360_v23 = vpop.f32.mrb[18].mxu1 }
 0x80a   : > { %v1363_v24 = vadd.f32 %v1358_v21, %v2994_v1  ;;  %v1989_v25 = vpop.f32.mrb[19].mxu1 }
 0x80c   : > { %v1365_v26 = vsel %vm731_vm1, %v1363_v24, 0.0 }
 0x80d   : > { %1366 = vadd.xlane.f32.xlu1 %v1365_v26 }
 0x89a   : > { %v1367_v27 = vpop.xlane.xlu1 %1366 }
 0x89b   : > { %v1368_v28 = vmul.f32 0.03125, %v1367_v27 }
 0x89d   : > { %v1369_v29 = vsub.f32 %v1363_v24, %v1368_v28 }
 0x89f   : > { %v1370_v30 = vmul.f32 %v1369_v29, %v1369_v29 }
 0x8a1   : > { %v1371_v32 = vsel %vm731_vm1, %v1370_v30, 0.0 }
 0x8a2   : > { %1372 = vadd.xlane.f32.xlu0 %v1371_v32 }
 0x92f   : > { %v1373_v1 = vpop.xlane.xlu0 %1372 }
 0x930   : > { %v1374_v35 = vmul.f32 0.03125, %v1373_v1 }
 0x932   : > { %v1375_v36 = vadd.f32 1e-05, %v1374_v35 }
 0x934   : > { %2187 = vrsqrt.f32 %v1375_v36 }
 0x93e   : > { %v2188_v38 = vpop.eup %2187 }
 0x93f   : > { %v1377_v40 = vmul.f32 %v2188_v38, %v1369_v29 }
 0x941   : > { %v1382_v41 = vmul.f32 %v1381_v37, %v1377_v40 }
 0x943   : > { %v1387_v42 = vadd.f32 %v1386_v39, %v1382_v41 }
 0x945   : > { %v1388_v43 = vpack.c.bf16 %v1387_v42, %v1387_v42 }
 0x947   : > { %1995 = vmatmul.mubr.msk.bf16.vlgmr.msra.gmra.mrb[20].mxu0 %vm731_vm1, %v1388_v43 }
 0xa1a   : > { %v1449_v49 = vpop.f32.mrb[20].mxu0 }
 0xa1b   : > { %v1450_v50 = vadd.f32 %v1873_v48, %v1449_v49  ;;  %v1996_v51 = vpop.f32.mrb[21].mxu0 }
 0xa1c   : > { %v1452_v52 = vpop.f32.mrb[22].mxu0 }
 0xa1d   : > { %v1455_v53 = vpack.c.bf16 %v1450_v50, %v1450_v50  ;;  %v1997_v54 = vpop.f32.mrb[23].mxu0 }
 0xa1f   : > { %v1456_v55 = vmul.bf16 3218784218, %v1455_v53 }
 0xa21   : > { %v1458_v56 = vmul.bf16 1069105081, %v1456_v55 }
 0xa23   : > { %2189 = vpow.bf16 %v1458_v56 }
 0xa2e   : > { %v2190_v57 = vpop.eup %2189 }
 0xa2f   : > { %v1460_v58 = vadd.bf16 1065369472, %v2190_v57 }
 0xa31   : > { %2191 = vrcp.bf16 %v1460_v58 }
 0xa3c   : > { %v2192_v59 = vpop.eup %2191 }
 0xa3d   : > { %v1462_v60 = vmul.bf16 1065369472, %v2192_v59 }
 0xa3f   : > { %v1463_v9 = vmul.bf16 %v1462_v60, %v1455_v53 }
 0xa41   : > { %2007 = vmatmul.mubr.msk.bf16.vlgmr.msra.gmra.mrb[20].mxu1 %vm1503_vm9, %v1463_v9 }
 0xb11   : > { %1551 = sbr.rel (%p1883_p4) target bundleno = 2842 (0xb1a), region = 104 }
 0xb14   : > { %v1541_v62 = vpop.f32.mrb[20].mxu1 }
 0xb15   : > { %v1542_v63 = vadd.f32 %v1877_v61, %v1541_v62  ;;  %v2008_v0 = vpop.f32.mrb[21].mxu1 }
 0xb16   : > { %v1544_v2 = vpop.f32.mrb[22].mxu1 }
 0xb17   : > { %v1547_v3 = vadd.f32 %v1542_v63, %v1363_v24  ;;  %v2009_v4 = vpop.f32.mrb[23].mxu1 }
 0xb19   : > { %1552 = vst.msk [vmem:[%s2989_s23] sm:$0xff] %vm731_vm1, %v1547_v3 }
 0xb1a PF: > { %p1884_p2 = scmp.ne.s32.totalorder %s2487_s14, 1 }
 0xb1b   : > { %v1558_v5 = vsel (!%p1884_p2), %vm731_vm1, %v1547_v3, 0.0  ;;  %s3289_s21 = sld [smem:[#allocation41_spill]] (!%p1884_p2) }
 0xb1c   : > { %1556 = sbr.rel (%p1884_p2) target bundleno = 3157 (0xc55), region = 108  ;;  %1559 = vadd.xlane.f32.xlu0 (!%p1884_p2), %v1558_v5 }
 0xb21   : > { %v1557_v15 = vld [vmem:[%s3289_s21] sm:$0x3] (!%p1884_p2) }
 0xb22   : > { %v1574_v17 = vrot.slane (!%p1884_p2), %v1557_v15, %v3010_v16  ;;  %v1579_v21 = vrot.slane (!%p1884_p2), %v1557_v15, %v3013_v18 }
 0xba9   : > { %v1560_v6 = vpop.xlane.xlu0 %1559 }
 0xbaa   : > { %v1561_v7 = vmul.f32 0.03125, %v1560_v6 }
 0xbac   : > { %v1562_v8 = vsub.f32 %v1547_v3, %v1561_v7 }
 0xbae   : > { %v1563_v10 = vmul.f32 %v1562_v8, %v1562_v8 }
 0xbb0   : > { %v1564_v11 = vsel %vm731_vm1, %v1563_v10, 0.0 }
 0xbb1   : > { %1565 = vadd.xlane.f32.xlu0 %v1564_v11 }
 0xc3e   : > { %v1566_v12 = vpop.xlane.xlu0 %1565 }
 0xc3f   : > { %v1567_v13 = vmul.f32 0.03125, %v1566_v12 }
 0xc41   : > { %v1568_v14 = vadd.f32 1e-05, %v1567_v13 }
 0xc43   : > { %2193 = vrsqrt.f32 %v1568_v14 }
 0xc4d   : > { %v2194_v19 = vpop.eup %2193 }
 0xc4e   : > { %v1570_v20 = vmul.f32 %v2194_v19, %v1562_v8 }
 0xc50   : > { %v1575_v22 = vmul.f32 %v1574_v17, %v1570_v20 }
 0xc52   : > { %v1580_v23 = vadd.f32 %v1579_v21, %v1575_v22 }
 0xc54   : > { %1581 = vst.msk [vmem:[%s2989_s23] sm:$0xff] %vm731_vm1, %v1580_v23 }
 0xc55 PF: > { %s3290_s14 = sld [smem:[#allocation21_spill]]  ;;  %s3291_s8 = sld [smem:[#allocation42_spill]] }
 0xc56   : > { %s1596_s1 = sshll.u32 %s2989_s23, 4  ;;  %s3292_s2 = sand.u32 1, %s2479_s29   ;;  %s1597_s1 = int_to_ptr.vmem [resolvable:$true] %s1596_s1 }
 0xc57   : > { %s1583_s7 = scalar_lea.sflag [#allocation5], %s3292_s2  ;;  %s2373_s9 = scalar_lea.vmem %s1597_s1, 128 }
 0xc58   : > { %p2374_p12 = scmp.ne.s32.totalorder %s1597_s1, %s2373_s9  ;;  %p3293_p1 = scmp.ne.s32.totalorder %s3268_s15, 0 }
 0xc59   : > { %s2527_s26 = smov [#allocation12]  }
 0xc5a   : > { %p2375_p6 = pnand %p2374_p12, %p3293_p1  ;;  %s2377_s30 = sshll.u32 %s2527_s26, 4  ;;  %s2378_s30 = int_to_ptr.vmem [resolvable:$false] %s2377_s30 }
 0xc5b   : > { %s1886_s20 = sshll.u32 %s3290_s14, 7  ;;  %s2379_s25 = scalar_lea.vmem %s2378_s30, 256 }
 0xc5c   : > { %s3134_s5 = scalar_lea.hbm %s3291_s8, %s1886_s20  ;;  %p2376_p8 = pneg %p2375_p6 }
 0xc5d   : > { %p2380_p3 = scmp.lt.s32.totalorder %s1597_s1, %s2378_s30  ;;  %p2381_p13 = scmp.lt.s32.totalorder %s2379_s25, %s2373_s9 }
 0xc5f   : > { %p2382_p9 = por %p2381_p13, %p2380_p3 }
 0xc61   : > { %p2383_p0 = pnand %p2382_p9, %p2376_p8 }
 0xc63   : > { %2386 = shalt.err (!%p2383_p0)
}
 0xc64   : > { %s2387_s23 = scalar_lea.hbm %s3134_s5, 128  ;;  %s2391_s19 = scalar_lea.hbm %s3291_s8, 256 }
 0xc65   : > { %p2388_p10 = scmp.ne.s32.totalorder %s3134_s5, %s2387_s23  ;;  %p2392_p5 = scmp.lt.u32.totalorder %s3134_s5, %s3291_s8 }
 0xc66   : > { %p2393_p4 = scmp.lt.u32.totalorder %s2391_s19, %s2387_s23  ;;  %p2395_p12 = scmp.lt.u32.totalorder %s2387_s23, %s3134_s5 }
 0xc67   : > { %p2389_p11 = pnand %p2388_p10, %p3293_p1 }
 0xc68   : > { %p2394_p2 = por %p2393_p4, %p2392_p5 }
 0xc69   : > { %p2390_p7 = pneg %p2389_p11 }
 0xc6a   : > { %p2396_p6 = por %p2395_p12, %p2394_p2 }
 0xc6c   : > { %p2397_p8 = pnand %p2396_p6, %p2390_p7 }
 0xc6e   : > { %2400 = shalt.err (!%p2397_p8)
}
 0xc6f   : > { %2024 = dma.vmem_to_hbm [thread:$0]  (%p3293_p1), %s1597_s1, 128, %s3134_s5, %s1583_s7  }
 0xc70 PF: > { %s3294_s10 = sld [smem:[#allocation19_spill]]  ;;  %s3295_s13 = sld [smem:[#allocation28_spill]] }
 0xc71   : > { %p2053_p3 = scmp.ge.s32.totalorder %s2503_s18, 2 }
 0xc76   : > { %s1608_s11 = sand.u32 1, %s3294_s10   ;;  %p3296_p13 = scmp.ne.s32.totalorder %s3295_s13, 0 }
 0xc77   : > { %s1609_s28 = scalar_lea.sflag [#allocation5], %s1608_s11 }
 0xc78   : > { %p2047_p9 = pnand %p2053_p3, %p3296_p13 }
 0xc7a   : > { %2458 = dma.done.wait (!%p2047_p9), %s1609_s28, 128  }
 0xc7b   : > { %2460 = vsyncadd (!%p2047_p9), %s1609_s28, 4294967168  ;;  %s30_s18 = sadd.s32 1, %s2503_s18   ;;  %s3297_s25 = sld [smem:[#allocation17_spill]] }
 0xc7c   : > { %p27_p0 = scmp.ge.s32.totalorder %s30_s18, 6   ;;  %s3298_s26 = sld [smem:[#allocation18_spill]] }
 0xc7d   : > { %s3299_s27 = sld [smem:[#allocation26_spill]]  ;;  %s3300_s15 = sld [smem:[#allocation20_spill]] }
 0xc7e   : > { %s3301_s30 = sld [smem:[#allocation27_spill]]  ;;  %s3302_s14 = sld [smem:[#allocation22_spill]] }
 0xc7f   : > { %s3303_s16 = sld [smem:[#allocation23_spill]]  ;;  %s3304_s0 = sld [smem:[#allocation24_spill]] }
 0xc80   : > { %s3305_s17 = sld [smem:[#allocation25_spill]]  ;;  %s3306_s28 = smov %s2479_s29 }
 0xc81   :  { %29 = sbr.rel (!%p27_p0) target bundleno = 25 (0x19), region = 195 }
 0xc83   : > { %s3307_s29 = smov %s3300_s15 }
 0xc85   : > { %s3308_s15 = smov %s3303_s16  ;;  %s3309_s16 = smov %s3304_s0 }
 0xc88   :  { %1614 = vsyncpa [#allocation4], 1 }
 0xc89   :  { %1616 = vsyncpa [#allocation4 + $0x1], 1 }
 0xc8a   :  { %1617 = vsyncpa [#allocation7], 1 }
 0xc8b   :  { %1618 = vsyncpa [#allocation5], 1 }
 0xc8c   :  { %1620 = vsyncpa [#allocation5 + $0x1], 1 }

</bundles_post_ra>
